<compile_context>
chip_gen: v6e
topology: v6e:2x2x1
jax: 0.10.0
libtpu: 0.0.40
codegen_flags: <defaults>
</compile_context>

<pallas_src>
import functools

import numpy as np
import jax
import jax.numpy as jnp
from jax import lax
from jax.experimental import pallas as pl
from jax.experimental.pallas import tpu as pltpu

HIDDEN1_SIZE = 100
HIDDEN2_SIZE = 50
LANE = 128
DEFAULT_T_CHUNK = 1024          # timesteps per Viterbi grid step (multiple of 128)


def _round_up(x, m):
    return ((x + m - 1) // m) * m


def _cdiv(a, b):
    return -(-a // b)


# ----------------------------------------------------------------------------
# trellis helper (external in the original repo)
# ----------------------------------------------------------------------------
def create_transition_table(n_states: int) -> np.ndarray:
    """Previous states of state s sit in row s: (2s % n, (2s+1) % n)."""
    return np.concatenate([np.arange(n_states), np.arange(n_states)]).reshape(n_states, 2)


# ----------------------------------------------------------------------------
# Pallas kernel 1 ('train' path): per-symbol DNN
#   Linear(1,100) -> Sigmoid -> Linear(100,50) -> ReLU -> Linear(50,n_states)
#   (feature dims zero-padded to 128 lanes; only the n_states real lanes are stored to HBM)
# ----------------------------------------------------------------------------
def _mlp_kernel(n_states, y_ref, w1_ref, b1_ref, w2_ref, b2_ref, w3_ref, b3_ref, out_ref):
    x = y_ref[...]                                              # (TM, 1) f32
    h1 = jax.nn.sigmoid(x * w1_ref[...] + b1_ref[...])          # (TM, 128)
    z2 = jnp.dot(h1, w2_ref[...], preferred_element_type=jnp.float32,
                 precision=jax.lax.Precision.HIGHEST) + b2_ref[...]
    h2 = jnp.maximum(z2, 0.0)
    z3 = jnp.dot(h2, w3_ref[...], preferred_element_type=jnp.float32,
                 precision=jax.lax.Precision.HIGHEST) + b3_ref[...]
    out_ref[...] = z3[:, :n_states]                             # only real states hit HBM


def mlp_priors_pallas(y2d, padded_params, n_states):
    """y2d: [B, T] -> priors [B*T, n_states] (f32)."""
    w1, b1, w2, b2, w3, b3 = padded_params
    B, T = y2d.shape
    N = B * T
    tile_m = 1024 if N >= 1024 else _round_up(max(N, 8), 8)
    n_pad = _round_up(N, tile_m)
    y_flat = y2d.reshape(N, 1).astype(jnp.float32)
    if n_pad != N:
        y_flat = jnp.pad(y_flat, ((0, n_pad - N), (0, 0)))
    full2 = lambda i: (0, 0)
    out = pl.pallas_call(
        functools.partial(_mlp_kernel, n_states),
        out_shape=jax.ShapeDtypeStruct((n_pad, n_states), jnp.float32),
        grid=(n_pad // tile_m,),
        in_specs=[
            pl.BlockSpec((tile_m, 1), lambda i: (i, 0)),
            pl.BlockSpec(w1.shape, full2),
            pl.BlockSpec(b1.shape, full2),
            pl.BlockSpec(w2.shape, full2),
            pl.BlockSpec(b2.shape, full2),
            pl.BlockSpec(w3.shape, full2),
            pl.BlockSpec(b3.shape, full2),
        ],
        out_specs=pl.BlockSpec((tile_m, n_states), lambda i: (i, 0)),
        compiler_params=pltpu.CompilerParams(dimension_semantics=("parallel",)),
    )(y_flat, w1, b1, w2, b2, w3, b3)
    return out[:N]


# ----------------------------------------------------------------------------
# Pallas kernel 2 ('val' path): fused MLP + Viterbi ACS loop
#   grid = (n_chunks,) ("arbitrary"); per chunk: MLP for all batch elements into a VMEM
#   scratch, then the serial ACS loop with the path metric carried in registers and batch
#   packed on the sublane axis.  Decision bits flushed as lane-dense 128-wide rows.
# ----------------------------------------------------------------------------
def _fused_val_kernel(n_states, n_batch, table, structured,
                      y_ref, w1_ref, b1_ref, w2_ref, b2_ref, w3_ref, b3_ref,
                      dec_ref, pr_ref, ip_ref):
    # y_ref:   (B, t_chunk, 1)   f32
    # dec_ref: (B, G, 128)       f32   (G = t_chunk // 128)
    # pr_ref:  (B, t_chunk, 128) f32   VMEM scratch (fused MLP output)
    # ip_ref:  (B, n_states)     f32   VMEM scratch (path metric carried across chunks)
    B = n_batch
    ns = n_states
    nsh = ns // 2
    G = dec_ref.shape[1]

    # ---- fused MLP for this chunk (weights stay resident; lane-dense VMEM stores) ----
    w1v, b1v = w1_ref[...], b1_ref[...]
    w2v, b2v = w2_ref[...], b2_ref[...]
    w3v, b3v = w3_ref[...], b3_ref[...]
    for b in range(B):                                          # static, B is small
        x = y_ref[b]                                            # (t_chunk, 1)
        h1 = jax.nn.sigmoid(x * w1v + b1v)                      # (t_chunk, 128)
        z2 = jnp.dot(h1, w2v, preferred_element_type=jnp.float32,
                     precision=jax.lax.Precision.HIGHEST) + b2v
        h2 = jnp.maximum(z2, 0.0)
        z3 = jnp.dot(h2, w3v, preferred_element_type=jnp.float32,
                     precision=jax.lax.Precision.HIGHEST) + b3v
        pr_ref[b] = z3                                          # (t_chunk, 128)

    # ---- init carried path metric on the first chunk ----
    @pl.when(pl.program_id(0) == 0)
    def _():
        ip_ref[...] = jnp.zeros_like(ip_ref)

    lane_idx = lax.broadcasted_iota(jnp.int32, (B, 128), 1)          # hoisted constants
    even_mask = (lax.broadcasted_iota(jnp.int32, (B, ns), 1) % 2) == 0
    big = jnp.float32(3.4e38)

    def load_priors_row(t):
        # (B, 128) slab of priors at timestep t; depends only on the loop index
        rows = [pr_ref[b, pl.ds(t, 1), :] for b in range(B)]
        p = rows[0] if B == 1 else jnp.concatenate(rows, axis=0)
        return p[:, :ns]                                             # (B, ns)

    def acs(ip, p):
        # out[s] = min_b (ip[table[s,b]] - p[table[s,b]])
        t = ip - p
        if structured:
            # table[s] = (2s % ns, (2s+1) % ns)  =>  out = tile(min(even, odd), 2)
            te = jnp.concatenate([t[:, 2 * k:2 * k + 1] for k in range(nsh)], axis=1)
            to = jnp.concatenate([t[:, 2 * k + 1:2 * k + 2] for k in range(nsh)], axis=1)
            m = jnp.minimum(te, to)
            return jnp.concatenate([m, m], axis=1)
        s0 = jnp.concatenate([t[:, table[s][0]:table[s][0] + 1] for s in range(ns)], axis=1)
        s1 = jnp.concatenate([t[:, table[s][1]:table[s][1] + 1] for s in range(ns)], axis=1)
        return jnp.minimum(s0, s1)

    def decision(ip):
        # argmin(ip) % 2, expressed as strict (min over odd states) < (min over even states)
        mn_e = jnp.min(jnp.where(even_mask, ip, big), axis=1, keepdims=True)
        mn_o = jnp.min(jnp.where(even_mask, big, ip), axis=1, keepdims=True)
        return (mn_o < mn_e).astype(jnp.float32)                     # (B, 1)

    @pl.loop(0, G)
    def _(g):
        ip0 = ip_ref[...]                                            # (B, ns) — once / 128 steps
        drow0 = jnp.zeros((B, 128), jnp.float32)

        def group8(gg, carry):                                       # 8 unrolled sub-steps
            ip, drow = carry
            base = g * 128 + gg * 8
            for k in range(8):
                p = load_priors_row(base + k)
                bit = decision(ip)
                drow = jnp.where(lane_idx == (gg * 8 + k), bit, drow)
                ip = acs(ip, p)
            return ip, drow

        ip, drow = lax.fori_loop(0, 128 // 8, group8, (ip0, drow0))
        for b in range(B):                                           # lane-dense row flush
            dec_ref[b, pl.ds(g, 1), :] = drow[b:b + 1, :]
        ip_ref[...] = ip


# ----------------------------------------------------------------------------
# Module wrapper
# ----------------------------------------------------------------------------
class VNETDetectorPallas:
    def __init__(self, n_states, transmission_lengths, key, t_chunk=DEFAULT_T_CHUNK):
        self.n_states = n_states
        self.transmission_lengths = transmission_lengths
        self.t_chunk_default = t_chunk
        self.transition_table = create_transition_table(n_states)
        self.structured = (n_states % 2 == 0)

        def init_linear(k, fan_in, fan_out):
            kw, kb = jax.random.split(k)
            bound = 1.0 / np.sqrt(fan_in)
            w = jax.random.uniform(kw, (fan_in, fan_out), jnp.float32, -bound, bound)
            b = jax.random.uniform(kb, (1, fan_out), jnp.float32, -bound, bound)
            return w, b

        k1, k2, k3 = jax.random.split(key, 3)
        w1, b1 = init_linear(k1, 1, HIDDEN1_SIZE)
        w2, b2 = init_linear(k2, HIDDEN1_SIZE, HIDDEN2_SIZE)
        w3, b3 = init_linear(k3, HIDDEN2_SIZE, n_states)
        self.params = (w1, b1, w2, b2, w3, b3)

        # zero-pad feature dims to the 128-lane width; padded columns contribute exact zeros
        h1p = _round_up(HIDDEN1_SIZE, LANE)
        h2p = _round_up(HIDDEN2_SIZE, LANE)
        nsp = _round_up(n_states, LANE)
        w1p = jnp.pad(w1, ((0, 0), (0, h1p - HIDDEN1_SIZE)))
        b1p = jnp.pad(b1, ((0, 0), (0, h1p - HIDDEN1_SIZE)))
        w2p = jnp.pad(w2, ((0, h1p - HIDDEN1_SIZE), (0, h2p - HIDDEN2_SIZE)))
        b2p = jnp.pad(b2, ((0, 0), (0, h2p - HIDDEN2_SIZE)))
        w3p = jnp.pad(w3, ((0, h2p - HIDDEN2_SIZE), (0, nsp - n_states)))
        b3p = jnp.pad(b3, ((0, 0), (0, nsp - n_states)))
        self.padded_params = (w1p, b1p, w2p, b2p, w3p, b3p)

    def _viterbi_val(self, y_pad, t_chunk, n_chunks):
        B, T_pad = y_pad.shape
        G = t_chunk // 128
        w1, b1, w2, b2, w3, b3 = self.padded_params
        table_py = tuple(tuple(int(v) for v in row) for row in np.asarray(self.transition_table))
        kernel = functools.partial(_fused_val_kernel, self.n_states, B, table_py, self.structured)
        y4 = y_pad.reshape(B, n_chunks, t_chunk, 1)                  # free reshape
        fullw = lambda c: (0, 0)
        dec = pl.pallas_call(
            kernel,
            out_shape=jax.ShapeDtypeStruct((B, n_chunks, G, 128), jnp.float32),
            grid=(n_chunks,),
            in_specs=[
                pl.BlockSpec((B, None, t_chunk, 1), lambda c: (0, c, 0, 0)),
                pl.BlockSpec(w1.shape, fullw),
                pl.BlockSpec(b1.shape, fullw),
                pl.BlockSpec(w2.shape, fullw),
                pl.BlockSpec(b2.shape, fullw),
                pl.BlockSpec(w3.shape, fullw),
                pl.BlockSpec(b3.shape, fullw),
            ],
            out_specs=pl.BlockSpec((B, None, G, 128), lambda c: (0, c, 0, 0)),
            scratch_shapes=[
                pltpu.VMEM((B, t_chunk, 128), jnp.float32),          # fused priors (per chunk)
                pltpu.VMEM((B, self.n_states), jnp.float32),         # carried path metric
            ],
            compiler_params=pltpu.CompilerParams(dimension_semantics=("arbitrary",)),
        )(y4, w1, b1, w2, b2, w3, b3)
        return dec.reshape(B, T_pad)                                 # free reshape

    def __call__(self, y, phase, snr=None, gamma=None, count=None):
        B, T = y.shape
        if phase == 'val':
            T_val = int(self.transmission_lengths['val'])
            if T_val <= 0:
                return jnp.zeros((B, T), jnp.float32)
            # chunk size: multiple of 128, capped so the priors scratch stays ~<= 8 MB
            t_chunk = min(self.t_chunk_default, _round_up(T_val, LANE))
            while B * t_chunk * 512 > 8 * 1024 * 1024 and t_chunk > 128:
                t_chunk //= 2
            t_chunk = max(128, (t_chunk // 128) * 128)
            n_chunks = _cdiv(T_val, t_chunk)
            T_pad = n_chunks * t_chunk
            if T >= T_pad:
                y_pad = y[:, :T_pad]
            else:
                y_pad = jnp.pad(y, ((0, 0), (0, T_pad - T)))
            dec = self._viterbi_val(y_pad.astype(jnp.float32), t_chunk, n_chunks)
            n_copy = min(T_val, T)
            decoded = jnp.zeros((B, T), jnp.float32).at[:, :n_copy].set(dec[:, :n_copy])
            return decoded
        # 'train' (or anything else): per-symbol priors [B, T, n_states]
        pr = mlp_priors_pallas(y.astype(jnp.float32), self.padded_params, self.n_states)
        return pr.reshape(B, T, self.n_states)


# ----------------------------------------------------------------------------
# Pure-JAX references (f32 HIGHEST, matching the original PyTorch f32 model)
# ----------------------------------------------------------------------------
def _ref_priors(y, params):
    w1, b1, w2, b2, w3, b3 = params
    x = y.reshape(-1, 1).astype(jnp.float32)
    h1 = jax.nn.sigmoid(x * w1 + b1)
    z2 = jnp.dot(h1, w2, preferred_element_type=jnp.float32,
                 precision=jax.lax.Precision.HIGHEST) + b2
    h2 = jnp.maximum(z2, 0.0)
    out = jnp.dot(h2, w3, preferred_element_type=jnp.float32,
                  precision=jax.lax.Precision.HIGHEST) + b3
    return out.reshape(y.shape[0], y.shape[1], -1)


def _ref_val(priors, table, t_val):
    B, T, NS = priors.shape
    table = jnp.asarray(np.asarray(table), jnp.int32)
    in_prob = jnp.zeros((B, NS), jnp.float32)
    dec = jnp.zeros((B, T), jnp.float32)
    for i in range(t_val):
        dec = dec.at[:, i].set((jnp.argmin(in_prob, axis=1) % 2).astype(jnp.float32))
        t = in_prob - priors[:, i]
        trellis = jnp.take(t, table.reshape(-1), axis=1).reshape(B, NS, 2)
        in_prob = jnp.min(trellis, axis=2)
    return dec


if __name__ == "__main__":
    key = jax.random.PRNGKey(0)
    k_param, k_y = jax.random.split(key)

    B, T, N_STATES = 2, 16, 4
    transmission_lengths = {'train': T, 'val': T}

    detector = VNETDetectorPallas(N_STATES, transmission_lengths, k_param)
    y = jax.random.normal(k_y, (B, T), jnp.float32)

    priors = detector(y, 'train')       # [B, T, n_states]
    decoded = detector(y, 'val')        # [B, T]
    jax.block_until_ready((priors, decoded))

    ref_p = _ref_priors(y, detector.params)
    assert priors.shape == (B, T, N_STATES)
    assert bool(jnp.allclose(priors, ref_p, atol=1e-4, rtol=1e-4)), "priors mismatch"

    ref_d = _ref_val(priors, detector.transition_table, transmission_lengths['val'])
    assert decoded.shape == (B, T)
    assert bool(jnp.all((decoded == 0.0) | (decoded == 1.0)))
    assert bool(jnp.array_equal(decoded, ref_d)), "decoded word mismatch"

    print("KERNEL_OK")
</pallas_src>

<mosaic_0001>
module attributes {stable_mosaic.version = 11 : i64} {
  func.func @_mlp_kernel(%arg0: i32, %arg1: memref<32x1xf32, #tpu.memory_space<vmem>>, %arg2: memref<1x128xf32, #tpu.memory_space<vmem>>, %arg3: memref<1x128xf32, #tpu.memory_space<vmem>>, %arg4: memref<128x128xf32, #tpu.memory_space<vmem>>, %arg5: memref<1x128xf32, #tpu.memory_space<vmem>>, %arg6: memref<128x128xf32, #tpu.memory_space<vmem>>, %arg7: memref<1x128xf32, #tpu.memory_space<vmem>>, %arg8: memref<32x4xf32, #tpu.memory_space<vmem>>) attributes {dimension_semantics = [#tpu.dimension_semantics<parallel>], iteration_bounds = array<i64: 1>, scalar_prefetch = 0 : i64, scratch_operands = 0 : i64, tpu.core_type = #tpu.core_type<tc>, window_params = [{transform_indices = @transform_0, window_bounds = array<i64: 32, 1>}, {pipeline_mode = #tpu.pipeline_mode<synchronous>, transform_indices = @transform_1, window_bounds = array<i64: 1, 128>}, {pipeline_mode = #tpu.pipeline_mode<synchronous>, transform_indices = @transform_2, window_bounds = array<i64: 1, 128>}, {pipeline_mode = #tpu.pipeline_mode<synchronous>, transform_indices = @transform_3, window_bounds = array<i64: 128, 128>}, {pipeline_mode = #tpu.pipeline_mode<synchronous>, transform_indices = @transform_4, window_bounds = array<i64: 1, 128>}, {pipeline_mode = #tpu.pipeline_mode<synchronous>, transform_indices = @transform_5, window_bounds = array<i64: 128, 128>}, {pipeline_mode = #tpu.pipeline_mode<synchronous>, transform_indices = @transform_6, window_bounds = array<i64: 1, 128>}, {transform_indices = @transform_7, window_bounds = array<i64: 32, 4>}]} {
    %c0 = arith.constant 0 : index
    %c0_0 = arith.constant 0 : index
    %0 = vector.load %arg1[%c0, %c0_0] : memref<32x1xf32, #tpu.memory_space<vmem>>, vector<32x1xf32>
    %c0_1 = arith.constant 0 : index
    %c0_2 = arith.constant 0 : index
    %1 = vector.load %arg2[%c0_1, %c0_2] : memref<1x128xf32, #tpu.memory_space<vmem>>, vector<1x128xf32>
    %2 = vector.broadcast %0 : vector<32x1xf32> to vector<32x128xf32>
    %3 = vector.broadcast %1 : vector<1x128xf32> to vector<32x128xf32>
    %4 = arith.mulf %2, %3 : vector<32x128xf32>
    %c0_3 = arith.constant 0 : index
    %c0_4 = arith.constant 0 : index
    %5 = vector.load %arg3[%c0_3, %c0_4] : memref<1x128xf32, #tpu.memory_space<vmem>>, vector<1x128xf32>
    %6 = vector.broadcast %5 : vector<1x128xf32> to vector<32x128xf32>
    %7 = arith.addf %4, %6 : vector<32x128xf32>
    %8 = arith.negf %7 : vector<32x128xf32>
    %9 = math.exp %8 : vector<32x128xf32>
    %cst = arith.constant 1.000000e+00 : f32
    %10 = vector.broadcast %cst : f32 to vector<32x128xf32>
    %11 = arith.addf %10, %9 : vector<32x128xf32>
    %12 = arith.divf %10, %11 : vector<32x128xf32>
    %c0_5 = arith.constant 0 : index
    %c0_6 = arith.constant 0 : index
    %13 = vector.load %arg4[%c0_5, %c0_6] : memref<128x128xf32, #tpu.memory_space<vmem>>, vector<128x128xf32>
    %cst_7 = arith.constant dense<0.000000e+00> : vector<32x128xf32>
    %14 = tpu.matmul %12, %13, %cst_7 {dimension_numbers = #tpu.dot_dimension_numbers<[1], [0], [0], [1], [0, 0, 1, 1], [], []>, precision = #tpu.contract_precision<fp32>} : vector<32x128xf32>, vector<128x128xf32>, vector<32x128xf32> -> vector<32x128xf32>
    %c0_8 = arith.constant 0 : index
    %c0_9 = arith.constant 0 : index
    %15 = vector.load %arg5[%c0_8, %c0_9] : memref<1x128xf32, #tpu.memory_space<vmem>>, vector<1x128xf32>
    %16 = vector.broadcast %15 : vector<1x128xf32> to vector<32x128xf32>
    %17 = arith.addf %14, %16 : vector<32x128xf32>
    %cst_10 = arith.constant 0.000000e+00 : f32
    %18 = vector.broadcast %cst_10 : f32 to vector<32x128xf32>
    %19 = arith.maximumf %17, %18 : vector<32x128xf32>
    %c0_11 = arith.constant 0 : index
    %c0_12 = arith.constant 0 : index
    %20 = vector.load %arg6[%c0_11, %c0_12] : memref<128x128xf32, #tpu.memory_space<vmem>>, vector<128x128xf32>
    %cst_13 = arith.constant dense<0.000000e+00> : vector<32x128xf32>
    %21 = tpu.matmul %19, %20, %cst_13 {dimension_numbers = #tpu.dot_dimension_numbers<[1], [0], [0], [1], [0, 0, 1, 1], [], []>, precision = #tpu.contract_precision<fp32>} : vector<32x128xf32>, vector<128x128xf32>, vector<32x128xf32> -> vector<32x128xf32>
    %c0_14 = arith.constant 0 : index
    %c0_15 = arith.constant 0 : index
    %22 = vector.load %arg7[%c0_14, %c0_15] : memref<1x128xf32, #tpu.memory_space<vmem>>, vector<1x128xf32>
    %23 = vector.broadcast %22 : vector<1x128xf32> to vector<32x128xf32>
    %24 = arith.addf %21, %23 : vector<32x128xf32>
    %25 = vector.extract_strided_slice %24 {offsets = [0, 0], sizes = [32, 4], strides = [1, 1]} : vector<32x128xf32> to vector<32x4xf32>
    %c0_16 = arith.constant 0 : index
    %c0_17 = arith.constant 0 : index
    %26 = vector.load %arg8[%c0_16, %c0_17] : memref<32x4xf32, #tpu.memory_space<vmem>>, vector<32x4xf32>
    tpu.vector_store %arg8[%c0_16, %c0_17], %25 {strides = array<i32>} : memref<32x4xf32, #tpu.memory_space<vmem>>, vector<32x4xf32>,
    return
  }
  func.func @transform_0(%arg0: i32) -> (i32, i32) {
    %c0_i32 = arith.constant 0 : i32
    %c0_i32_0 = arith.constant 0 : i32
    return %arg0, %c0_i32 : i32, i32
  }
  func.func @transform_1(%arg0: i32) -> (i32, i32) {
    %c0_i32 = arith.constant 0 : i32
    %c0_i32_0 = arith.constant 0 : i32
    %c0_i32_1 = arith.constant 0 : i32
    return %c0_i32, %c0_i32_0 : i32, i32
  }
  func.func @transform_2(%arg0: i32) -> (i32, i32) {
    %c0_i32 = arith.constant 0 : i32
    %c0_i32_0 = arith.constant 0 : i32
    %c0_i32_1 = arith.constant 0 : i32
    return %c0_i32, %c0_i32_0 : i32, i32
  }
  func.func @transform_3(%arg0: i32) -> (i32, i32) {
    %c0_i32 = arith.constant 0 : i32
    %c0_i32_0 = arith.constant 0 : i32
    %c0_i32_1 = arith.constant 0 : i32
    return %c0_i32, %c0_i32_0 : i32, i32
  }
  func.func @transform_4(%arg0: i32) -> (i32, i32) {
    %c0_i32 = arith.constant 0 : i32
    %c0_i32_0 = arith.constant 0 : i32
    %c0_i32_1 = arith.constant 0 : i32
    return %c0_i32, %c0_i32_0 : i32, i32
  }
  func.func @transform_5(%arg0: i32) -> (i32, i32) {
    %c0_i32 = arith.constant 0 : i32
    %c0_i32_0 = arith.constant 0 : i32
    %c0_i32_1 = arith.constant 0 : i32
    return %c0_i32, %c0_i32_0 : i32, i32
  }
  func.func @transform_6(%arg0: i32) -> (i32, i32) {
    %c0_i32 = arith.constant 0 : i32
    %c0_i32_0 = arith.constant 0 : i32
    %c0_i32_1 = arith.constant 0 : i32
    return %c0_i32, %c0_i32_0 : i32, i32
  }
  func.func @transform_7(%arg0: i32) -> (i32, i32) {
    %c0_i32 = arith.constant 0 : i32
    %c0_i32_0 = arith.constant 0 : i32
    return %arg0, %c0_i32 : i32, i32
  }
}

</mosaic_0001>

<bundles_post_ra>
// kernel: tpu_custom_call.1
= control target key start
LH: loop header
LB: loop body
LE: loop exit
PB: predicated region body
PF: predicated region fallthrough
CT: control target
= control target key end

     0   :  { %12 = vsyncpa [#allocation3], 0  ;;  %s3329_s0 = inlined_call_operand.vmem [shape: f32[32,1], index: 0, kind: input, shape index: {}]   ;;  %s3330_s1 = inlined_call_operand.vmem [shape: f32[1,128], index: 1, kind: input, shape index: {}]   ;;  %s3331_s2 = inlined_call_operand.vmem [shape: f32[1,128], index: 2, kind: input, shape index: {}]   ;;  %s3332_s3 = inlined_call_operand.hbm [shape: f32[128,128], index: 3, kind: input, shape index: {}]   ;;  %s3333_s4 = inlined_call_operand.vmem [shape: f32[1,128], index: 4, kind: input, shape index: {}]   ;;  %s3334_s5 = inlined_call_operand.hbm [shape: f32[128,128], index: 5, kind: input, shape index: {}]   ;;  %s3335_s6 = inlined_call_operand.vmem [shape: f32[1,128], index: 6, kind: input, shape index: {}]   ;;  %s3336_s7 = inlined_call_operand.vmem [shape: f32[32,4], index: 7, kind: output, shape index: {}]  }
   0x1   :  { %13 = vsyncpa [#allocation5], 0  ;;  %s2496_s24 = smov [#allocation2]  }
   0x2   :  { %s25_s25 = sshll.u32 %s2496_s24, 4  ;;  %s26_s25 = int_to_ptr.vmem [resolvable:$true] %s25_s25 }
   0x3   :  { %s2460_s26 = scalar_lea.vmem %s26_s25, 2048  ;;  %p2465_p1 = scmp.lt.s32.totalorder %s26_s25, %s26_s25 }
   0x4   :  { %p2461_p0 = scmp.ne.s32.totalorder %s26_s25, %s2460_s26  ;;  %p2466_p2 = scmp.lt.s32.totalorder %s2460_s26, %s2460_s26 }
   0x6   :  { %p2467_p3 = por %p2466_p2, %p2465_p1 }
   0x8   :  { %p2468_p4 = pnand %p2467_p3, %p2461_p0 }
   0xa   :  { %2471 = shalt.err (!%p2468_p4)
}
   0xb   :  { %s2497_s27 = smov 128   ;;  %s2498_s28 = smov 8  }
   0xc   :  { %31 = dma.hbm_to_vmem [thread:$0]  %s3332_s3, 2048, %s26_s25, [#allocation3], %s2497_s27, %s2497_s27, %s2498_s28  }
   0xd   :  { %s2499_s8 = smov [#allocation4]  }
   0xe   :  { %s39_s9 = sshll.u32 %s2499_s8, 4  ;;  %s40_s9 = int_to_ptr.vmem [resolvable:$true] %s39_s9 }
   0xf   :  { %s2480_s10 = scalar_lea.vmem %s40_s9, 2048  ;;  %p2485_p6 = scmp.lt.s32.totalorder %s40_s9, %s40_s9 }
  0x10   :  { %p2481_p5 = scmp.ne.s32.totalorder %s40_s9, %s2480_s10  ;;  %p2486_p7 = scmp.lt.s32.totalorder %s2480_s10, %s2480_s10 }
  0x12   :  { %p2487_p8 = por %p2486_p7, %p2485_p6 }
  0x14   :  { %p2488_p9 = pnand %p2487_p8, %p2481_p5 }
  0x16   :  { %2491 = shalt.err (!%p2488_p9)
}
  0x17   :  { %45 = dma.hbm_to_vmem [thread:$0]  %s3334_s5, 2048, %s40_s9, [#allocation5], %s2497_s27, %s2497_s27, %s2498_s28  }
  0x18   :  { %2492 = dma.done.wait [#allocation3], 2048  }
  0x19   :  { %2493 = vsyncadd [#allocation3], 4294965248 }
  0x1a   :  { %2494 = dma.done.wait [#allocation5], 2048  }
  0x1b   :  { %2495 = vsyncadd [#allocation5], 4294965248  ;;  %v2500_v0 = vmov 0   ;;  %v54_v1 = vld [vmem:[%s3329_s0] sm:$0xff]  ;;  %v56_v2 = vld [vmem:[%s3329_s0 + $0x10] sm:$0xff]  ;;  %vm1714_vm0 = vcmask 31744  }
  0x1c   :  { %2434 = vset.pattern.permute.xlu0 %v2500_v0  ;;  %2435 = vset.pattern.permute.xlu1 %v2500_v0  ;;  %v55_v3 = vld [vmem:[%s3329_s0 + $0x8] sm:$0xff]  ;;  %v57_v4 = vld [vmem:[%s3329_s0 + $0x18] sm:$0xff]  ;;  %v138_v6 = vld [vmem:[#allocation2 + $0x70] sm:$0xff] }
  0x1d   :  { %61 = vperm.xlu0 %2434, %v54_v1   ;;  %71 = vperm.xlu1 %2435, %v56_v2   ;;  %v139_v5 = vld [vmem:[#allocation2 + $0x78] sm:$0xff]  ;;  %v137_v7 = vld [vmem:[#allocation2 + $0x68] sm:$0xff]  ;;  %v2561_v9 = vand.u32 4294901760, %v138_v6  ;;  %v136_v11 = vld [vmem:[#allocation2 + $0x60] sm:$0xff] }
  0x1e   :  { %v2559_v8 = vand.u32 4294901760, %v139_v5  ;;  %v2563_v10 = vand.u32 4294901760, %v137_v7  ;;  %v135_v12 = vld [vmem:[#allocation2 + $0x58] sm:$0xff]  ;;  %v2565_v13 = vand.u32 4294901760, %v136_v11  ;;  %v134_v18 = vld [vmem:[#allocation2 + $0x50] sm:$0xff]  ;;  %v133_v25 = vld [vmem:[#allocation2 + $0x48] sm:$0xff] }
  0x1f   :  { %v2567_v14 = vand.u32 4294901760, %v135_v12  ;;  %v2573_v16 = vsub.f32 %v138_v6, %v2561_v9  ;;  %v2585_v21 = vand.u32 4294901760, %v134_v18  ;;  %v2607_v29 = vand.u32 4294901760, %v133_v25  ;;  %v132_v33 = vld [vmem:[#allocation2 + $0x40] sm:$0xff]  ;;  %v131_v40 = vld [vmem:[#allocation2 + $0x38] sm:$0xff]  ;;  %v130_v46 = vld [vmem:[#allocation2 + $0x30] sm:$0xff] }
  0x20   :  { %v2570_v15 = vsub.f32 %v139_v5, %v2559_v8  ;;  %v2576_v17 = vsub.f32 %v137_v7, %v2563_v10  ;;  %v2579_v19 = vsub.f32 %v136_v11, %v2565_v13  ;;  %1973 = vmatprep.subr.mxu0 %v2559_v8  ;;  %v2626_v39 = vand.u32 4294901760, %v132_v33  ;;  %v129_v52 = vld [vmem:[#allocation2 + $0x28] sm:$0xff]  ;;  %v128_v58 = vld [vmem:[#allocation2 + $0x20] sm:$0xff]  ;;  %v127_v0 = vld [vmem:[#allocation2 + $0x18] sm:$0xff] }
  0x21   :  { %66 = vperm.xlu0 %2434, %v55_v3   ;;  %76 = vperm.xlu1 %2435, %v57_v4   ;;  %v2583_v20 = vsub.f32 %v135_v12, %v2567_v14  ;;  %v2591_v23 = vand.u32 4294901760, %v2573_v16  ;;  %v2605_v28 = vsub.f32 %v134_v18, %v2585_v21  ;;  %v2620_v35 = vsub.f32 %v133_v25, %v2607_v29  ;;  %v126_v6 = vld [vmem:[#allocation2 + $0x10] sm:$0xff] }
  0x22   :  { %v2588_v22 = vand.u32 4294901760, %v2570_v15  ;;  %v2594_v24 = vand.u32 4294901760, %v2576_v17  ;;  %1974 = vmatpush3.msra.mxu0 %v2559_v8  ;;  %v2598_v26 = vand.u32 4294901760, %v2579_v19  ;;  %v2635_v44 = vsub.f32 %v132_v33, %v2626_v39 }
  0x23   :  { %v2601_v27 = vand.u32 4294901760, %v2583_v20  ;;  %1975 = vmatprep.subr.mxu0 %v2561_v9  ;;  %v279_v31 = vsub.f32 %v2573_v16, %v2591_v23  ;;  %v2623_v38 = vand.u32 4294901760, %v2605_v28  ;;  %v2632_v43 = vand.u32 4294901760, %v2620_v35 }
  0x24   :  { %v272_v30 = vsub.f32 %v2570_v15, %v2588_v22  ;;  %v286_v32 = vsub.f32 %v2576_v17, %v2594_v24  ;;  %1976 = vmatpush3.msra.mxu0 %v2561_v9  ;;  %v293_v34 = vsub.f32 %v2579_v19, %v2598_v26  ;;  %v2638_v45 = vand.u32 4294901760, %v131_v40 }
  0x25   :  { %1977 = vmatprep.subr.mxu0 %v2563_v10  ;;  %v280_v37 = vand.u32 4294901760, %v279_v31  ;;  %v300_v41 = vsub.f32 %v2583_v20, %v2601_v27  ;;  %v2641_v47 = vand.u32 4294901760, %v130_v46  ;;  %v307_v49 = vsub.f32 %v2605_v28, %v2623_v38 }
  0x26   :  { %v273_v36 = vand.u32 4294901760, %v272_v30  ;;  %1978 = vmatpush3.msra.mxu0 %v2563_v10  ;;  %v287_v42 = vand.u32 4294901760, %v286_v32  ;;  %v294_v48 = vand.u32 4294901760, %v293_v34  ;;  %v2646_v50 = vand.u32 4294901760, %v2635_v44  ;;  %v125_v30 = vld [vmem:[#allocation2 + $0x8] sm:$0xff] }
  0x27   :  { %1979 = vmatprep.subr.mxu0 %v2565_v13  ;;  %v2649_v51 = vsub.f32 %v131_v40, %v2638_v45  ;;  %v2654_v53 = vsub.f32 %v130_v46, %v2641_v47  ;;  %v2656_v54 = vand.u32 4294901760, %v129_v52  ;;  %v301_v55 = vand.u32 4294901760, %v300_v41 }
  0x28   :  { %2011 = vmatprep.subr.mxu1 %v273_v36  ;;  %1980 = vmatpush3.msra.mxu0 %v2565_v13  ;;  %v314_v56 = vsub.f32 %v2620_v35, %v2632_v43  ;;  %v2668_v60 = vand.u32 4294901760, %v128_v58  ;;  %v308_v61 = vand.u32 4294901760, %v307_v49  ;;  %v321_v62 = vsub.f32 %v2635_v44, %v2646_v50 }
  0x29   :  { %2012 = vmatpush3.msra.mxu1 %v273_v36  ;;  %1981 = vmatprep.subr.mxu0 %v2567_v14  ;;  %v2661_v57 = vand.u32 4294901760, %v2649_v51  ;;  %v2666_v59 = vsub.f32 %v129_v52, %v2656_v54  ;;  %v2673_v63 = vand.u32 4294901760, %v2654_v53  ;;  %v2680_v2 = vand.u32 4294901760, %v127_v0 }
  0x2a   :  { %2013 = vmatprep.subr.mxu1 %v280_v37  ;;  %1982 = vmatpush3.msra.mxu0 %v2567_v14  ;;  %v2678_v1 = vsub.f32 %v128_v58, %v2668_v60  ;;  %v315_v3 = vand.u32 4294901760, %v314_v56  ;;  %v322_v11 = vand.u32 4294901760, %v321_v62  ;;  %v2698_v25 = vand.u32 4294901760, %v126_v6 }
  0x2b   :  { %2014 = vmatpush3.msra.mxu1 %v280_v37  ;;  %1983 = vmatprep.subr.mxu0 %v2585_v21  ;;  %v328_v4 = vsub.f32 %v2649_v51, %v2661_v57  ;;  %v2685_v5 = vand.u32 4294901760, %v2666_v59  ;;  %v2690_v7 = vsub.f32 %v127_v0, %v2680_v2  ;;  %v335_v12 = vsub.f32 %v2654_v53, %v2673_v63  ;;  %v124_v37 = vld [vmem:[#allocation2] sm:$0xff] }
  0x2c   :  { %2015 = vmatprep.subr.mxu1 %v287_v42  ;;  %1984 = vmatpush3.msra.mxu0 %v2585_v21  ;;  %v2695_v18 = vand.u32 4294901760, %v2678_v1  ;;  %v2701_v31 = vand.u32 4294901760, %v125_v30  ;;  %v2709_v36 = vsub.f32 %v126_v6, %v2698_v25  ;;  %v2716_v41 = vand.u32 4294901760, %v124_v37 }
  0x2d   :  { %2016 = vmatpush3.msra.mxu1 %v287_v42  ;;  %1985 = vmatprep.subr.mxu0 %v2607_v29  ;;  %v329_v32 = vand.u32 4294901760, %v328_v4  ;;  %v342_v33 = vsub.f32 %v2666_v59, %v2685_v5  ;;  %v2706_v34 = vand.u32 4294901760, %v2690_v7  ;;  %v336_v42 = vand.u32 4294901760, %v335_v12 }
  0x2e   :  { %2017 = vmatprep.subr.mxu1 %v294_v48  ;;  %1986 = vmatpush3.msra.mxu0 %v2607_v29  ;;  %v2714_v40 = vsub.f32 %v125_v30, %v2701_v31  ;;  %v349_v46 = vsub.f32 %v2678_v1, %v2695_v18  ;;  %v2726_v49 = vsub.f32 %v124_v37, %v2716_v41  ;;  %v1725_v30 = vld [vmem:[%s3330_s1] ss:$0 sm:$0xff] }
  0x2f   :  { %2018 = vmatpush3.msra.mxu1 %v294_v48  ;;  %1987 = vmatprep.subr.mxu0 %v2626_v39  ;;  %3383 = vst [vmem:[#allocation8_spill] sm:$0xff] %v2706_v34  ;;  %v2721_v48 = vand.u32 4294901760, %v2709_v36  ;;  %v343_v52 = vand.u32 4294901760, %v342_v33 }
  0x30   :  { %2019 = vmatprep.subr.mxu1 %v301_v55  ;;  %1988 = vmatpush3.msra.mxu0 %v2626_v39  ;;  %v2731_v56 = vand.u32 4294901760, %v2714_v40  ;;  %v350_v58 = vand.u32 4294901760, %v349_v46  ;;  %v2738_v62 = vand.u32 4294901760, %v2726_v49 }
  0x31   :  { %2020 = vmatpush3.msra.mxu1 %v301_v55  ;;  %1989 = vmatprep.subr.mxu0 %v2638_v45  ;;  %3384 = vst [vmem:[#allocation9_spill] sm:$0xff] %v2721_v48  ;;  %v356_v55 = vsub.f32 %v2690_v7, %v2706_v34 }
  0x32   :  { %2021 = vmatprep.subr.mxu1 %v308_v61  ;;  %1990 = vmatpush3.msra.mxu0 %v2638_v45  ;;  %3385 = vst [vmem:[#allocation10_spill] sm:$0xff] %v2731_v56  ;;  %3386 = vst [vmem:[#allocation11_spill] sm:$0xff] %v2738_v62  ;;  %v377_v6 = vsub.f32 %v2726_v49, %v2738_v62 }
  0x33   :  { %2022 = vmatpush3.msra.mxu1 %v308_v61  ;;  %1991 = vmatprep.subr.mxu0 %v2641_v47  ;;  %v363_v61 = vsub.f32 %v2709_v36, %v2721_v48  ;;  %v357_v0 = vand.u32 4294901760, %v356_v55 }
  0x34   :  { %2023 = vmatprep.subr.mxu1 %v315_v3  ;;  %1992 = vmatpush3.msra.mxu0 %v2641_v47  ;;  %v378_v12 = vand.u32 4294901760, %v377_v6 }
  0x35   :  { %2024 = vmatpush3.msra.mxu1 %v315_v3  ;;  %1993 = vmatprep.subr.mxu0 %v2656_v54  ;;  %v370_v3 = vsub.f32 %v2714_v40, %v2731_v56  ;;  %v364_v4 = vand.u32 4294901760, %v363_v61 }
  0x36   :  { %2025 = vmatprep.subr.mxu1 %v322_v11  ;;  %1994 = vmatpush3.msra.mxu0 %v2656_v54 }
  0x37   :  { %2026 = vmatpush3.msra.mxu1 %v322_v11  ;;  %1995 = vmatprep.subr.mxu0 %v2668_v60  ;;  %v371_v11 = vand.u32 4294901760, %v370_v3 }
  0x38   :  { %2027 = vmatprep.subr.mxu1 %v329_v32  ;;  %1996 = vmatpush3.msra.mxu0 %v2668_v60 }
  0x39   :  { %2028 = vmatpush3.msra.mxu1 %v329_v32  ;;  %1997 = vmatprep.subr.mxu0 %v2680_v2  ;;  %v1726_v32 = vld [vmem:[%s3331_s2] ss:$0 sm:$0xff] }
  0x3a   :  { %2029 = vmatprep.subr.mxu1 %v336_v42  ;;  %1998 = vmatpush3.msra.mxu0 %v2680_v2 }
  0x3b   :  { %2030 = vmatpush3.msra.mxu1 %v336_v42  ;;  %1999 = vmatprep.subr.mxu0 %v2698_v25 }
  0x3c   :  { %2031 = vmatprep.subr.mxu1 %v343_v52  ;;  %2000 = vmatpush3.msra.mxu0 %v2698_v25 }
  0x3d   :  { %2032 = vmatpush3.msra.mxu1 %v343_v52  ;;  %2001 = vmatprep.subr.mxu0 %v2701_v31 }
  0x3e   :  { %2033 = vmatprep.subr.mxu1 %v350_v58  ;;  %2002 = vmatpush3.msra.mxu0 %v2701_v31 }
  0x3f   :  { %2034 = vmatpush3.msra.mxu1 %v350_v58  ;;  %2003 = vmatprep.subr.mxu0 %v2716_v41 }
  0x40   :  { %2035 = vmatprep.subr.mxu1 %v357_v0  ;;  %2004 = vmatpush3.msra.mxu0 %v2716_v41 }
  0x41   :  { %2036 = vmatpush3.msra.mxu1 %v357_v0  ;;  %2049 = vmatprep.subr.mxu0 %v2570_v15 }
  0x42   :  { %2037 = vmatprep.subr.mxu1 %v364_v4 }
  0x43   :  { %2038 = vmatpush3.msra.mxu1 %v364_v4 }
  0x44   :  { %2039 = vmatprep.subr.mxu1 %v371_v11 }
  0x45   :  { %2040 = vmatpush3.msra.mxu1 %v371_v11 }
  0x46   :  { %2041 = vmatprep.subr.mxu1 %v378_v12 }
  0x47   :  { %2042 = vmatpush3.msra.mxu1 %v378_v12 }
  0x48   :  { %2087 = vmatprep.subr.mxu1 %v2559_v8 }
  0x98   :  { %v62_v33 = vpop.permute.xlu0 %61  ;;  %v72_v37 = vpop.permute.xlu1 %71 }
  0x99   :  { %v85_v42 = vmul.f32 %v1725_v30, %v62_v33  ;;  %v87_v46 = vmul.f32 %v1725_v30, %v72_v37 }
  0x9b   :  { %v96_v52 = vadd.f32 %v1726_v32, %v85_v42  ;;  %v98_v55 = vadd.f32 %v1726_v32, %v87_v46 }
  0x9c   :  { %v67_v58 = vpop.permute.xlu0 %66  ;;  %v77_v61 = vpop.permute.xlu1 %76 }
  0x9d   :  { %v1727_v0 = vmul.f32 -1.442695, %v96_v52  ;;  %v1729_v3 = vmul.f32 -1.442695, %v98_v55  ;;  %v86_v4 = vmul.f32 %v1725_v30, %v67_v58  ;;  %v88_v6 = vmul.f32 %v1725_v30, %v77_v61 }
  0x9f   :  { %2436 = vpow2.f32 %v1727_v0  ;;  %v97_v11 = vadd.f32 %v1726_v32, %v86_v4  ;;  %v99_v12 = vadd.f32 %v1726_v32, %v88_v6 }
  0xa0   :  { %2438 = vpow2.f32 %v1729_v3 }
  0xa1   :  { %v1728_v62 = vmul.f32 -1.442695, %v97_v11  ;;  %v1730_v56 = vmul.f32 -1.442695, %v99_v12 }
  0xa3   :  { %2440 = vpow2.f32 %v1728_v62 }
  0xa4   :  { %2442 = vpow2.f32 %v1730_v56 }
  0xac   :  { %v2437_v48 = vpop.eup %2436 }
  0xad   :  { %v2439_v34 = vpop.eup %2438  ;;  %v112_v33 = vadd.f32 1.0, %v2437_v48 }
  0xae   :  { %v114_v37 = vadd.f32 1.0, %v2439_v34 }
  0xaf   :  { %2444 = vrcp.f32 %v112_v33 }
  0xb0   :  { %v2441_v42 = vpop.eup %2440  ;;  %2446 = vrcp.f32 %v114_v37 }
  0xb1   :  { %v2443_v46 = vpop.eup %2442  ;;  %v113_v52 = vadd.f32 1.0, %v2441_v42 }
  0xb2   :  { %v115_v55 = vadd.f32 1.0, %v2443_v46 }
  0xb3   :  { %2448 = vrcp.f32 %v113_v52 }
  0xb4   :  { %2450 = vrcp.f32 %v115_v55 }
  0xbc   :  { %v2445_v30 = vpop.eup %2444 }
  0xbd   :  { %v2447_v58 = vpop.eup %2446  ;;  %v2759_v32 = vand.u32 4294901760, %v2445_v30 }
  0xbe   :  { %v2761_v61 = vand.u32 4294901760, %v2447_v58 }
  0xbf   :  { %2043 = vmatprep.mubr.f32.mxu1 %v2759_v32  ;;  %v229_v56 = vsub.f32 %v2445_v30, %v2759_v32 }
  0xc0   :  { %v2449_v48 = vpop.eup %2448  ;;  %v2766_v34 = vsub.f32 %v2447_v58, %v2761_v61 }
  0xc1   :  { %v2451_v62 = vpop.eup %2450  ;;  %v2768_v0 = vand.u32 4294901760, %v2449_v48  ;;  %v230_v3 = vand.u32 4294901760, %v229_v56 }
  0xc2   :  { %v2770_v4 = vand.u32 4294901760, %v2451_v62  ;;  %v250_v12 = vand.u32 4294901760, %v2766_v34 }
  0xc3   :  { %2044 = vmatmul.mubr.f32.vlgmr.msra.gmra.mxu1 %v2768_v0  ;;  %v231_v6 = vsub.f32 %v229_v56, %v230_v3  ;;  %v2774_v11 = vsub.f32 %v2449_v48, %v2768_v0 }
  0xc4   :  { %2088 = vmatpush3.msra.mxu1 %v2559_v8  ;;  %2046 = vmatprep.mubr.f32.mxu1 %v2761_v61  ;;  %v2780_v33 = vsub.f32 %v2451_v62, %v2770_v4  ;;  %v251_v55 = vsub.f32 %v2766_v34, %v250_v12 }
  0xc5   :  { %2089 = vmatprep.subr.mxu1 %v2561_v9  ;;  %v232_v37 = vand.u32 4294901760, %v231_v6  ;;  %v240_v42 = vand.u32 4294901760, %v2774_v11 }
  0xc6   :  { %2090 = vmatpush3.msra.mxu1 %v2561_v9  ;;  %v260_v46 = vand.u32 4294901760, %v2780_v33  ;;  %v252_v48 = vand.u32 4294901760, %v251_v55 }
  0xc7   :  { %2091 = vmatprep.subr.mxu1 %v2563_v10  ;;  %2005 = vmatprep.mubr.f32.mxu0 %v232_v37  ;;  %v241_v52 = vsub.f32 %v2774_v11, %v240_v42  ;;  %v926_v37 = vld [vmem:[#allocation4 + $0x28] sm:$0xff] }
  0xc8   :  { %2047 = vmatmul.mubr.f32.gmra.mxu1 %v2770_v4  ;;  %v261_v58 = vsub.f32 %v2780_v33, %v260_v46  ;;  %v3047_v55 = vand.u32 4294901760, %v926_v37 }
  0xc9   :  { %2092 = vmatpush3.msra.mxu1 %v2563_v10  ;;  %2119 = vmatprep.mubr.f32.mxu1 %v230_v3  ;;  %v242_v30 = vand.u32 4294901760, %v241_v52 }
  0xca   :  { %2093 = vmatprep.subr.mxu1 %v2565_v13  ;;  %v262_v62 = vand.u32 4294901760, %v261_v58 }
  0xcb   :  { %2094 = vmatpush3.msra.mxu1 %v2565_v13  ;;  %2006 = vmatmul.mubr.f32.vlgmr.msra.gmra.mxu0 %v242_v30  ;;  %v925_v30 = vld [vmem:[#allocation4 + $0x20] sm:$0xff] }
  0xcc   :  { %2095 = vmatprep.subr.mxu1 %v2567_v14  ;;  %2050 = vmatpush3.msra.mxu0 %v2570_v15 }
  0xcd   :  { %2096 = vmatpush3.msra.mxu1 %v2567_v14  ;;  %2051 = vmatprep.subr.mxu0 %v2573_v16 }
  0xce   :  { %2097 = vmatprep.subr.mxu1 %v2585_v21  ;;  %2052 = vmatpush3.msra.mxu0 %v2573_v16  ;;  %v935_v16 = vld [vmem:[#allocation4 + $0x70] sm:$0xff] }
  0xcf   :  { %2098 = vmatpush3.msra.mxu1 %v2585_v21  ;;  %2008 = vmatprep.mubr.f32.mxu0 %v252_v48 }
  0xd0   :  { %2053 = vmatprep.subr.mxu0 %v2576_v17  ;;  %2099 = vmatprep.subr.mxu1 %v2607_v29 }
  0xd1   :  { %2009 = vmatmul.mubr.f32.gmra.mxu0 %v262_v62  ;;  %2100 = vmatpush3.msra.mxu1 %v2607_v29 }
  0xd2   :  { %2054 = vmatpush3.msra.mxu0 %v2576_v17  ;;  %2081 = vmatprep.mubr.f32.mxu0 %v229_v56  ;;  %v928_v56 = vld [vmem:[#allocation4 + $0x38] sm:$0xff] }
  0xd3   :  { %2055 = vmatprep.subr.mxu0 %v2579_v19  ;;  %2101 = vmatprep.subr.mxu1 %v2626_v39  ;;  %v3025_v3 = vand.u32 4294901760, %v928_v56 }
  0xd4   :  { %2056 = vmatpush3.msra.mxu0 %v2579_v19  ;;  %2102 = vmatpush3.msra.mxu1 %v2626_v39  ;;  %v2941_v19 = vand.u32 4294901760, %v935_v16 }
  0xd5   :  { %2057 = vmatprep.subr.mxu0 %v2583_v20  ;;  %2103 = vmatprep.subr.mxu1 %v2638_v45 }
  0xd6   :  { %2058 = vmatpush3.msra.mxu0 %v2583_v20  ;;  %2104 = vmatpush3.msra.mxu1 %v2638_v45  ;;  %v934_v20 = vld [vmem:[#allocation4 + $0x68] sm:$0xff] }
  0xd7   :  { %2059 = vmatprep.subr.mxu0 %v2605_v28  ;;  %2105 = vmatprep.subr.mxu1 %v2641_v47 }
  0xd8   :  { %2060 = vmatpush3.msra.mxu0 %v2605_v28  ;;  %2106 = vmatpush3.msra.mxu1 %v2641_v47 }
  0xd9   :  { %2061 = vmatprep.subr.mxu0 %v2620_v35  ;;  %2107 = vmatprep.subr.mxu1 %v2656_v54 }
  0xda   :  { %2062 = vmatpush3.msra.mxu0 %v2620_v35  ;;  %2108 = vmatpush3.msra.mxu1 %v2656_v54 }
  0xdb   :  { %2063 = vmatprep.subr.mxu0 %v2635_v44  ;;  %2109 = vmatprep.subr.mxu1 %v2668_v60 }
  0xdc   :  { %2064 = vmatpush3.msra.mxu0 %v2635_v44  ;;  %2110 = vmatpush3.msra.mxu1 %v2668_v60 }
  0xdd   :  { %2065 = vmatprep.subr.mxu0 %v2649_v51  ;;  %2111 = vmatprep.subr.mxu1 %v2680_v2 }
  0xde   :  { %2066 = vmatpush3.msra.mxu0 %v2649_v51  ;;  %2112 = vmatpush3.msra.mxu1 %v2680_v2 }
  0xdf   :  { %2067 = vmatprep.subr.mxu0 %v2654_v53  ;;  %2113 = vmatprep.subr.mxu1 %v2698_v25 }
  0xe0   :  { %2068 = vmatpush3.msra.mxu0 %v2654_v53  ;;  %2114 = vmatpush3.msra.mxu1 %v2698_v25 }
  0xe1   :  { %2069 = vmatprep.subr.mxu0 %v2666_v59  ;;  %2115 = vmatprep.subr.mxu1 %v2701_v31 }
  0xe2   :  { %2070 = vmatpush3.msra.mxu0 %v2666_v59  ;;  %2116 = vmatpush3.msra.mxu1 %v2701_v31 }
  0xe3   :  { %2071 = vmatprep.subr.mxu0 %v2678_v1  ;;  %2117 = vmatprep.subr.mxu1 %v2716_v41 }
  0xe4   :  { %2072 = vmatpush3.msra.mxu0 %v2678_v1  ;;  %2118 = vmatpush3.msra.mxu1 %v2716_v41 }
  0xe5   :  { %2073 = vmatprep.subr.mxu0 %v2690_v7  ;;  %2120 = vmatmul.mubr.f32.vlgmr.msra.gmra.mxu1 %v240_v42 }
  0xe6   :  { %2163 = vmatprep.subr.mxu1 %v2559_v8  ;;  %2074 = vmatpush3.msra.mxu0 %v2690_v7 }
  0xe7   :  { %2122 = vmatprep.mubr.f32.mxu1 %v250_v12  ;;  %2164 = vmatpush3.msra.mxu1 %v2559_v8  ;;  %v3387_v8 = vld [vmem:[#allocation8_spill] sm:$0xff]  ;;  %v3033_v12 = vsub.f32 %v928_v56, %v3025_v3 }
  0xe8   :  { %2075 = vmatprep.subr.mxu0 %v2709_v36  ;;  %2165 = vmatprep.subr.mxu1 %v2561_v9 }
  0xe9   :  { %2076 = vmatpush3.msra.mxu0 %v2709_v36  ;;  %2166 = vmatpush3.msra.mxu1 %v2561_v9  ;;  %v3388_v9 = vld [vmem:[#allocation9_spill] sm:$0xff] }
  0xea   :  { %2077 = vmatprep.subr.mxu0 %v2714_v40  ;;  %2123 = vmatmul.mubr.f32.gmra.mxu1 %v260_v46  ;;  %v3042_v46 = vand.u32 4294901760, %v3033_v12 }
  0xeb   :  { %2167 = vmatprep.subr.mxu1 %v2563_v10  ;;  %2078 = vmatpush3.msra.mxu0 %v2714_v40  ;;  %v929_v40 = vld [vmem:[#allocation4 + $0x40] sm:$0xff] }
  0xec   :  { %2168 = vmatpush3.msra.mxu1 %v2563_v10  ;;  %2195 = vmatprep.mubr.f32.mxu1 %v2759_v32  ;;  %v3389_v10 = vld [vmem:[#allocation10_spill] sm:$0xff]  ;;  %3399 = vst [vmem:[#allocation16_spill] sm:$0xff] %v3042_v46  ;;  %v1125_v48 = vsub.f32 %v3033_v12, %v3042_v46 }
  0xed   :  { %2079 = vmatprep.subr.mxu0 %v2726_v49  ;;  %2169 = vmatprep.subr.mxu1 %v2565_v13 }
  0xee   :  { %2080 = vmatpush3.msra.mxu0 %v2726_v49  ;;  %2170 = vmatpush3.msra.mxu1 %v2565_v13  ;;  %v3390_v13 = vld [vmem:[#allocation11_spill] sm:$0xff] }
  0xef   :  { %2082 = vmatmul.mubr.f32.vlgmr.msra.gmra.mxu0 %v2774_v11  ;;  %2125 = vmatprep.subr.mxu0 %v2588_v22 }
  0xf0   :  { %2171 = vmatprep.subr.mxu1 %v2567_v14  ;;  %2084 = vmatprep.mubr.f32.mxu0 %v2766_v34 }
  0xf1   :  { %2126 = vmatpush3.msra.mxu0 %v2588_v22  ;;  %2172 = vmatpush3.msra.mxu1 %v2567_v14  ;;  %v936_v14 = vld [vmem:[#allocation4 + $0x78] sm:$0xff]  ;;  %v2949_v22 = vsub.f32 %v935_v16, %v2941_v19 }
  0xf2   :  { %2127 = vmatprep.subr.mxu0 %v2591_v23  ;;  %2173 = vmatprep.subr.mxu1 %v2585_v21  ;;  %v2936_v15 = vand.u32 4294901760, %v936_v14 }
  0xf3   :  { %2128 = vmatpush3.msra.mxu0 %v2591_v23  ;;  %2174 = vmatpush3.msra.mxu1 %v2585_v21  ;;  %v2951_v23 = vand.u32 4294901760, %v934_v20 }
  0xf4   :  { %2085 = vmatmul.mubr.f32.gmra.mxu0 %v2780_v33  ;;  %2129 = vmatprep.subr.mxu0 %v2594_v24  ;;  %v2939_v17 = vsub.f32 %v936_v14, %v2936_v15 }
  0xf5   :  { %2175 = vmatprep.subr.mxu1 %v2607_v29  ;;  %2130 = vmatpush3.msra.mxu0 %v2594_v24  ;;  %v933_v24 = vld [vmem:[#allocation4 + $0x60] sm:$0xff]  ;;  %v2961_v35 = vsub.f32 %v934_v20, %v2951_v23 }
  0xf6   :  { %2157 = vmatprep.mubr.f32.mxu0 %v2759_v32  ;;  %2176 = vmatpush3.msra.mxu1 %v2607_v29  ;;  %v2946_v21 = vand.u32 4294901760, %v2939_v17  ;;  %v2958_v29 = vand.u32 4294901760, %v2949_v22  ;;  %v3018_v32 = vand.u32 4294901760, %v929_v40 }
  0xf7   :  { %2131 = vmatprep.subr.mxu0 %v2598_v26  ;;  %2177 = vmatprep.subr.mxu1 %v2626_v39  ;;  %v2976_v51 = vand.u32 4294901760, %v2961_v35 }
  0xf8   :  { %2132 = vmatpush3.msra.mxu0 %v2598_v26  ;;  %2178 = vmatpush3.msra.mxu1 %v2626_v39  ;;  %3391 = vst [vmem:[#allocation8_spill] sm:$0xff] %v2946_v21  ;;  %v932_v26 = vld [vmem:[#allocation4 + $0x58] sm:$0xff]  ;;  %v1069_v28 = vsub.f32 %v2939_v17, %v2946_v21  ;;  %3392 = vst [vmem:[#allocation9_spill] sm:$0xff] %v2958_v29  ;;  %v930_v39 = vld [vmem:[#allocation4 + $0x48] sm:$0xff] }
  0xf9   :  { %2133 = vmatprep.subr.mxu0 %v2601_v27  ;;  %2179 = vmatprep.subr.mxu1 %v2638_v45  ;;  %3393 = vst [vmem:[#allocation10_spill] sm:$0xff] %v2976_v51 }
  0xfa   :  { %2134 = vmatpush3.msra.mxu0 %v2601_v27  ;;  %2180 = vmatpush3.msra.mxu1 %v2638_v45  ;;  %v931_v27 = vld [vmem:[#allocation4 + $0x50] sm:$0xff]  ;;  %v2970_v45 = vand.u32 4294901760, %v930_v39 }
  0xfb   :  { %2135 = vmatprep.subr.mxu0 %v2623_v38  ;;  %2181 = vmatprep.subr.mxu1 %v2641_v47  ;;  %v2968_v44 = vand.u32 4294901760, %v931_v27 }
  0xfc   :  { %2136 = vmatpush3.msra.mxu0 %v2623_v38  ;;  %2182 = vmatpush3.msra.mxu1 %v2641_v47  ;;  %v2963_v38 = vand.u32 4294901760, %v933_v24  ;;  %v1070_v47 = vand.u32 4294901760, %v1069_v28  ;;  %v2989_v59 = vsub.f32 %v930_v39, %v2970_v45 }
  0xfd   :  { %2137 = vmatprep.subr.mxu0 %v2632_v43  ;;  %2183 = vmatprep.subr.mxu1 %v2656_v54 }
  0xfe   :  { %2138 = vmatpush3.msra.mxu0 %v2632_v43  ;;  %2184 = vmatpush3.msra.mxu1 %v2656_v54  ;;  %v2966_v43 = vand.u32 4294901760, %v932_v26  ;;  %v2979_v53 = vsub.f32 %v933_v24, %v2963_v38  ;;  %v3005_v7 = vand.u32 4294901760, %v2989_v59 }
  0xff   :  { %2139 = vmatprep.subr.mxu0 %v2646_v50  ;;  %2185 = vmatprep.subr.mxu1 %v2668_v60 }
 0x100   :  { %2140 = vmatpush3.msra.mxu0 %v2646_v50  ;;  %2186 = vmatpush3.msra.mxu1 %v2668_v60  ;;  %v1076_v50 = vsub.f32 %v2949_v22, %v2958_v29  ;;  %v2983_v54 = vsub.f32 %v932_v26, %v2966_v43  ;;  %v2995_v1 = vand.u32 4294901760, %v2979_v53  ;;  %3397 = vst [vmem:[#allocation14_spill] sm:$0xff] %v3005_v7  ;;  %v923_v26 = vld [vmem:[#allocation4 + $0x10] sm:$0xff] }
 0x101   :  { %2141 = vmatprep.subr.mxu0 %v2661_v57  ;;  %2187 = vmatprep.subr.mxu1 %v2680_v2  ;;  %v1111_v49 = vsub.f32 %v2989_v59, %v3005_v7 }
 0x102   :  { %2142 = vmatpush3.msra.mxu0 %v2661_v57  ;;  %2188 = vmatpush3.msra.mxu1 %v2680_v2  ;;  %v2986_v57 = vsub.f32 %v931_v27, %v2968_v44  ;;  %v1077_v60 = vand.u32 4294901760, %v1076_v50  ;;  %3394 = vst [vmem:[#allocation11_spill] sm:$0xff] %v2995_v1  ;;  %v2999_v2 = vand.u32 4294901760, %v2983_v54 }
 0x103   :  { %2143 = vmatprep.subr.mxu0 %v2673_v63  ;;  %2189 = vmatprep.subr.mxu1 %v2698_v25  ;;  %v1112_v6 = vand.u32 4294901760, %v1111_v49 }
 0x104   :  { %2144 = vmatpush3.msra.mxu0 %v2673_v63  ;;  %2190 = vmatpush3.msra.mxu1 %v2698_v25  ;;  %v1083_v63 = vsub.f32 %v2961_v35, %v2976_v51  ;;  %3395 = vst [vmem:[#allocation12_spill] sm:$0xff] %v2999_v2  ;;  %v1090_v25 = vsub.f32 %v2979_v53, %v2995_v1 }
 0x105   :  { %2145 = vmatprep.subr.mxu0 %v2685_v5  ;;  %2191 = vmatprep.subr.mxu1 %v2701_v31 }
 0x106   :  { %2146 = vmatpush3.msra.mxu0 %v2685_v5  ;;  %2192 = vmatpush3.msra.mxu1 %v2701_v31  ;;  %v3002_v5 = vand.u32 4294901760, %v2986_v57  ;;  %v1097_v31 = vsub.f32 %v2983_v54, %v2999_v2 }
 0x107   :  { %2147 = vmatprep.subr.mxu0 %v2695_v18  ;;  %2193 = vmatprep.subr.mxu1 %v2716_v41 }
 0x108   :  { %2148 = vmatpush3.msra.mxu0 %v2695_v18  ;;  %2194 = vmatpush3.msra.mxu1 %v2716_v41  ;;  %3396 = vst [vmem:[#allocation13_spill] sm:$0xff] %v3002_v5  ;;  %v1084_v18 = vand.u32 4294901760, %v1083_v63  ;;  %v1104_v36 = vsub.f32 %v2986_v57, %v3002_v5  ;;  %v1091_v41 = vand.u32 4294901760, %v1090_v25 }
 0x109   :  { %2149 = vmatprep.subr.mxu0 %v3387_v8  ;;  %2196 = vmatmul.mubr.f32.vlgmr.msra.gmra.mxu1 %v2768_v0 }
 0x10a   :  { %2150 = vmatpush3.msra.mxu0 %v3387_v8  ;;  %2198 = vmatprep.mubr.f32.mxu1 %v2761_v61  ;;  %v1105_v34 = vand.u32 4294901760, %v1104_v36  ;;  %v3057_v8 = vsub.f32 %v926_v37, %v3047_v55 }
 0x10b   :  { %2151 = vmatprep.subr.mxu0 %v3388_v9  ;;  %2239 = vmatprep.subr.mxu1 %v1070_v47 }
 0x10c   :  { %2152 = vmatpush3.msra.mxu0 %v3388_v9  ;;  %2240 = vmatpush3.msra.mxu1 %v1070_v47  ;;  %v3060_v9 = vand.u32 4294901760, %v925_v30  ;;  %v3066_v16 = vand.u32 4294901760, %v3057_v8  ;;  %v3079_v47 = vand.u32 4294901760, %v923_v26 }
 0x10d   :  { %2153 = vmatprep.subr.mxu0 %v3389_v10  ;;  %2199 = vmatmul.mubr.f32.gmra.mxu1 %v2770_v4 }
 0x10e   :  { %2154 = vmatpush3.msra.mxu0 %v3389_v10  ;;  %2241 = vmatprep.subr.mxu1 %v1077_v60  ;;  %v924_v10 = vld [vmem:[#allocation4 + $0x18] sm:$0xff]  ;;  %3401 = vst [vmem:[#allocation18_spill] sm:$0xff] %v3066_v16  ;;  %v3071_v24 = vsub.f32 %v925_v30, %v3060_v9  ;;  %v1139_v28 = vsub.f32 %v3057_v8, %v3066_v16 }
 0x10f   :  { %2155 = vmatprep.subr.mxu0 %v3390_v13  ;;  %2242 = vmatpush3.msra.mxu1 %v1077_v60  ;;  %v3068_v20 = vand.u32 4294901760, %v924_v10  ;;  %v922_v60 = vld [vmem:[#allocation4 + $0x8] sm:$0xff]  ;;  %v3090_v25 = vsub.f32 %v923_v26, %v3079_v47 }
 0x110   :  { %2156 = vmatpush3.msra.mxu0 %v3390_v13  ;;  %2243 = vmatprep.subr.mxu1 %v1084_v18  ;;  %v1126_v13 = vand.u32 4294901760, %v1125_v48  ;;  %v3083_v50 = vand.u32 4294901760, %v3071_v24  ;;  %v1140_v63 = vand.u32 4294901760, %v1139_v28 }
 0x111   :  { %2158 = vmatmul.mubr.f32.vlgmr.msra.gmra.mxu0 %v2768_v0  ;;  %2201 = vmatprep.subr.mxu0 %v2936_v15  ;;  %v3023_v0 = vsub.f32 %v929_v40, %v3018_v32  ;;  %v3077_v39 = vsub.f32 %v924_v10, %v3068_v20  ;;  %3404 = vst [vmem:[#allocation21_spill] sm:$0xff] %v3090_v25  ;;  %v921_v40 = vld [vmem:[#allocation4] sm:$0xff]  ;;  %v3101_v49 = vand.u32 4294901760, %v3090_v25 }
 0x112   :  { %2160 = vmatprep.mubr.f32.mxu0 %v2761_v61  ;;  %2202 = vmatpush3.msra.mxu0 %v2936_v15  ;;  %v1098_v61 = vand.u32 4294901760, %v1097_v31  ;;  %3402 = vst [vmem:[#allocation19_spill] sm:$0xff] %v3083_v50  ;;  %v3092_v31 = vand.u32 4294901760, %v922_v60  ;;  %v1146_v36 = vsub.f32 %v3071_v24, %v3083_v50  ;;  %v3106_v56 = vand.u32 4294901760, %v921_v40 }
 0x113   :  { %2203 = vmatprep.subr.mxu0 %v2941_v19  ;;  %2244 = vmatpush3.msra.mxu1 %v1084_v18  ;;  %v3030_v11 = vand.u32 4294901760, %v3023_v0  ;;  %v3087_v18 = vand.u32 4294901760, %v3077_v39  ;;  %3405 = vst [vmem:[#allocation22_spill] sm:$0xff] %v3101_v49 }
 0x114   :  { %2204 = vmatpush3.msra.mxu0 %v2941_v19  ;;  %2245 = vmatprep.subr.mxu1 %v1091_v41 }
 0x115   :  { %2161 = vmatmul.mubr.f32.gmra.mxu0 %v2770_v4  ;;  %2205 = vmatprep.subr.mxu0 %v2951_v23  ;;  %v927_v4 = vld [vmem:[#allocation4 + $0x30] sm:$0xff]  ;;  %3398 = vst [vmem:[#allocation15_spill] sm:$0xff] %v3030_v11  ;;  %v1118_v42 = vsub.f32 %v3023_v0, %v3030_v11  ;;  %3403 = vst [vmem:[#allocation20_spill] sm:$0xff] %v3087_v18 }
 0x116   :  { %2206 = vmatpush3.msra.mxu0 %v2951_v23  ;;  %2246 = vmatpush3.msra.mxu1 %v1091_v41  ;;  %v3035_v33 = vand.u32 4294901760, %v927_v4  ;;  %v1153_v41 = vsub.f32 %v3077_v39, %v3087_v18 }
 0x117   :  { %2207 = vmatprep.subr.mxu0 %v2963_v38  ;;  %2247 = vmatprep.subr.mxu1 %v1098_v61  ;;  %v1119_v58 = vand.u32 4294901760, %v1118_v42  ;;  %v3116_v42 = vsub.f32 %v921_v40, %v3106_v56 }
 0x118   :  { %2208 = vmatpush3.msra.mxu0 %v2963_v38  ;;  %2248 = vmatpush3.msra.mxu1 %v1098_v61  ;;  %v3045_v52 = vsub.f32 %v927_v4, %v3035_v33  ;;  %v3104_v61 = vsub.f32 %v922_v60, %v3092_v31  ;;  %v1154_v4 = vand.u32 4294901760, %v1153_v41 }
 0x119   :  { %2209 = vmatprep.subr.mxu0 %v2966_v43  ;;  %2249 = vmatprep.subr.mxu1 %v1105_v34  ;;  %3408 = vst [vmem:[#allocation25_spill] sm:$0xff] %v3116_v42  ;;  %v3123_v48 = vand.u32 4294901760, %v3116_v42 }
 0x11a   :  { %2210 = vmatpush3.msra.mxu0 %v2966_v43  ;;  %2250 = vmatpush3.msra.mxu1 %v1105_v34  ;;  %v3054_v62 = vand.u32 4294901760, %v3045_v52  ;;  %3406 = vst [vmem:[#allocation23_spill] sm:$0xff] %v3104_v61  ;;  %v1147_v34 = vand.u32 4294901760, %v1146_v36  ;;  %v3113_v37 = vand.u32 4294901760, %v3104_v61 }
 0x11b   :  { %2211 = vmatprep.subr.mxu0 %v2968_v44  ;;  %2251 = vmatprep.subr.mxu1 %v1112_v6  ;;  %3409 = vst [vmem:[#allocation26_spill] sm:$0xff] %v3123_v48 }
 0x11c   :  { %2212 = vmatpush3.msra.mxu0 %v2968_v44  ;;  %3400 = vst [vmem:[#allocation17_spill] sm:$0xff] %v3054_v62  ;;  %2252 = vmatpush3.msra.mxu1 %v1112_v6  ;;  %v1132_v14 = vsub.f32 %v3045_v52, %v3054_v62  ;;  %v1160_v6 = vsub.f32 %v3090_v25, %v3101_v49  ;;  %3407 = vst [vmem:[#allocation24_spill] sm:$0xff] %v3113_v37 }
 0x11d   :  { %2213 = vmatprep.subr.mxu0 %v2970_v45  ;;  %2253 = vmatprep.subr.mxu1 %v1119_v58 }
 0x11e   :  { %2214 = vmatpush3.msra.mxu0 %v2970_v45  ;;  %2254 = vmatpush3.msra.mxu1 %v1119_v58  ;;  %v1133_v27 = vand.u32 4294901760, %v1132_v14  ;;  %v1161_v30 = vand.u32 4294901760, %v1160_v6  ;;  %v1167_v58 = vsub.f32 %v3104_v61, %v3113_v37 }
 0x11f   :  { %2215 = vmatprep.subr.mxu0 %v3018_v32  ;;  %2255 = vmatprep.subr.mxu1 %v1126_v13 }
 0x120   :  { %2216 = vmatpush3.msra.mxu0 %v3018_v32  ;;  %2256 = vmatpush3.msra.mxu1 %v1126_v13  ;;  %v1168_v10 = vand.u32 4294901760, %v1167_v58  ;;  %v1174_v13 = vsub.f32 %v3116_v42, %v3123_v48 }
 0x121   :  { %2217 = vmatprep.subr.mxu0 %v3025_v3  ;;  %2257 = vmatprep.subr.mxu1 %v1133_v27 }
 0x122   :  { %2218 = vmatpush3.msra.mxu0 %v3025_v3  ;;  %2258 = vmatpush3.msra.mxu1 %v1133_v27  ;;  %v1175_v14 = vand.u32 4294901760, %v1174_v13 }
 0x123   :  { %2219 = vmatprep.subr.mxu0 %v3035_v33  ;;  %2259 = vmatprep.subr.mxu1 %v1140_v63 }
 0x124   :  { %2220 = vmatpush3.msra.mxu0 %v3035_v33  ;;  %2260 = vmatpush3.msra.mxu1 %v1140_v63 }
 0x125   :  { %2221 = vmatprep.subr.mxu0 %v3047_v55  ;;  %2261 = vmatprep.subr.mxu1 %v1147_v34 }
 0x126   :  { %2222 = vmatpush3.msra.mxu0 %v3047_v55  ;;  %2262 = vmatpush3.msra.mxu1 %v1147_v34 }
 0x127   :  { %2223 = vmatprep.subr.mxu0 %v3060_v9  ;;  %2263 = vmatprep.subr.mxu1 %v1154_v4 }
 0x128   :  { %2224 = vmatpush3.msra.mxu0 %v3060_v9  ;;  %2264 = vmatpush3.msra.mxu1 %v1154_v4  ;;  %v1731_v4 = vld [vmem:[%s3333_s4] ss:$0 sm:$0xff] }
 0x129   :  { %2225 = vmatprep.subr.mxu0 %v3068_v20  ;;  %2265 = vmatprep.subr.mxu1 %v1161_v30 }
 0x12a   :  { %2226 = vmatpush3.msra.mxu0 %v3068_v20  ;;  %2266 = vmatpush3.msra.mxu1 %v1161_v30 }
 0x12b   :  { %2227 = vmatprep.subr.mxu0 %v3079_v47  ;;  %2267 = vmatprep.subr.mxu1 %v1168_v10 }
 0x12c   :  { %2228 = vmatpush3.msra.mxu0 %v3079_v47  ;;  %2268 = vmatpush3.msra.mxu1 %v1168_v10 }
 0x12d   :  { %2229 = vmatprep.subr.mxu0 %v3092_v31  ;;  %2269 = vmatprep.subr.mxu1 %v1175_v14 }
 0x12e   :  { %2230 = vmatpush3.msra.mxu0 %v3092_v31  ;;  %2270 = vmatpush3.msra.mxu1 %v1175_v14 }
 0x12f   :  { %2231 = vmatprep.subr.mxu0 %v3106_v56  ;;  %2315 = vmatprep.subr.mxu1 %v2936_v15 }
 0x130   :  { %2232 = vmatpush3.msra.mxu0 %v3106_v56 }
 0x131   :  { %2277 = vmatprep.subr.mxu0 %v2939_v17 }
 0x183   :  { %v2045_v26 = vpop.f32.mrf.mxu1 }
 0x185   :  { %v415_v27 = vpop.f32.mrf.mxu1 }
 0x188   :  { %v2048_v60 = vpop.f32.mrf.mxu1 }
 0x18a   :  { %v427_v40 = vpop.f32.mrf.mxu1 }
 0x18b   :  { %v2007_v28 = vpop.f32.mrf.mxu0 }
 0x18c   :  { %v245_v58 = vadd.f32 %v2007_v28, %v1731_v4 }
 0x18d   :  { %v234_v63 = vpop.f32.mrf.mxu0 }
 0x18e   :  { %v235_v14 = vadd.f32 %v1731_v4, %v234_v63  ;;  %v422_v37 = vadd.f32 %v2045_v26, %v245_v58 }
 0x190   :  { %v416_v62 = vadd.f32 %v415_v27, %v235_v14 }
 0x191   :  { %v2010_v36 = vpop.f32.mrf.mxu0 }
 0x192   :  { %v265_v48 = vadd.f32 %v2010_v36, %v1731_v4 }
 0x193   :  { %v254_v34 = vpop.f32.mrf.mxu0 }
 0x194   :  { %v255_v50 = vadd.f32 %v1731_v4, %v254_v34  ;;  %v434_v11 = vadd.f32 %v2048_v60, %v265_v48 }
 0x196   :  { %v428_v2 = vadd.f32 %v427_v40, %v255_v50 }
 0x1a5   :  { %v2121_v41 = vpop.f32.mrf.mxu1 }
 0x1a7   :  { %v647_v6 = vpop.f32.mrf.mxu1 }
 0x1aa   :  { %v2124_v10 = vpop.f32.mrf.mxu1 }
 0x1ac   :  { %v663_v49 = vpop.f32.mrf.mxu1 }
 0x1af   :  { %v2083_v30 = vpop.f32.mrf.mxu0 }
 0x1b0   :  { %v545_v16 = vadd.f32 %v2083_v30, %v422_v37 }
 0x1b1   :  { %v537_v13 = vpop.f32.mrf.mxu0 }
 0x1b2   :  { %v538_v7 = vadd.f32 %v537_v13, %v416_v62  ;;  %v656_v51 = vadd.f32 %v2121_v41, %v545_v16 }
 0x1b4   :  { %v2086_v18 = vpop.f32.mrf.mxu0  ;;  %v648_v61 = vadd.f32 %v647_v6, %v538_v7 }
 0x1b5   :  { %v559_v1 = vadd.f32 %v2086_v18, %v434_v11 }
 0x1b6   :  { %v551_v5 = vpop.f32.mrf.mxu0 }
 0x1b7   :  { %v552_v28 = vadd.f32 %v551_v5, %v428_v2  ;;  %v672_v58 = vadd.f32 %v2124_v10, %v559_v1 }
 0x1b9   :  { %v664_v48 = vadd.f32 %v663_v49, %v552_v28 }
 0x1c9   :  { %v2197_v46 = vpop.f32.mrf.mxu1 }
 0x1cb   :  { %v895_v29 = vpop.f32.mrf.mxu1 }
 0x1cd   :  { %v2200_v25 = vpop.f32.mrf.mxu1 }
 0x1cf   :  { %v907_v18 = vpop.f32.mrf.mxu1 }
 0x1d1   :  { %v2159_v21 = vpop.f32.mrf.mxu0 }
 0x1d2   :  { %v797_v42 = vadd.f32 %v2159_v21, %v656_v51 }
 0x1d3   :  { %v790_v63 = vpop.f32.mrf.mxu0 }
 0x1d4   :  { %v902_v36 = vadd.f32 %v2197_v46, %v797_v42  ;;  %v791_v26 = vadd.f32 %v790_v63, %v648_v61 }
 0x1d5   :  { %v2162_v34 = vpop.f32.mrf.mxu0 }
 0x1d6   :  { %v918_v37 = vmax.f32 %v902_v36, 0.0  ;;  %v896_v27 = vadd.f32 %v895_v29, %v791_v26  ;;  %v809_v4 = vadd.f32 %v2162_v34, %v672_v58 }
 0x1d7   :  { %v802_v62 = vpop.f32.mrf.mxu0 }
 0x1d8   :  { %v3133_v60 = vand.u32 4294901760, %v918_v37  ;;  %v917_v11 = vmax.f32 %v896_v27, 0.0  ;;  %v914_v16 = vadd.f32 %v2200_v25, %v809_v4  ;;  %v803_v50 = vadd.f32 %v802_v62, %v664_v48 }
 0x1da   :  { %v3136_v21 = vsub.f32 %v918_v37, %v3133_v60  ;;  %v3138_v51 = vand.u32 4294901760, %v917_v11  ;;  %v920_v2 = vmax.f32 %v914_v16, 0.0  ;;  %v908_v1 = vadd.f32 %v907_v18, %v803_v50 }
 0x1dc   :  { %v1037_v5 = vand.u32 4294901760, %v3136_v21  ;;  %v1026_v29 = vsub.f32 %v917_v11, %v3138_v51  ;;  %v3142_v7 = vand.u32 4294901760, %v920_v2  ;;  %v919_v46 = vmax.f32 %v908_v1, 0.0  ;;  %2271 = vmatprep.mubr.f32.mxu1 %v3138_v51 }
 0x1dd   :  { %2272 = vmatmul.mubr.f32.vlgmr.msra.gmra.mxu1 %v3133_v60 }
 0x1de   :  { %v3147_v25 = vsub.f32 %v920_v2, %v3142_v7  ;;  %v3149_v49 = vand.u32 4294901760, %v919_v46  ;;  %2316 = vmatpush3.msra.mxu1 %v2936_v15  ;;  %v1027_v61 = vand.u32 4294901760, %v1026_v29  ;;  %v1038_v42 = vsub.f32 %v3136_v21, %v1037_v5 }
 0x1df   :  { %2317 = vmatprep.subr.mxu1 %v2941_v19 }
 0x1e0   :  { %v3157_v40 = vsub.f32 %v919_v46, %v3149_v49  ;;  %2318 = vmatpush3.msra.mxu1 %v2941_v19  ;;  %2274 = vmatprep.mubr.f32.mxu1 %v3149_v49  ;;  %v1028_v41 = vsub.f32 %v1026_v29, %v1027_v61  ;;  %v1057_v6 = vand.u32 4294901760, %v3147_v25  ;;  %v1039_v13 = vand.u32 4294901760, %v1038_v42 }
 0x1e1   :  { %2319 = vmatprep.subr.mxu1 %v2951_v23  ;;  %2275 = vmatmul.mubr.f32.gmra.mxu1 %v3142_v7 }
 0x1e2   :  { %2320 = vmatpush3.msra.mxu1 %v2951_v23  ;;  %2347 = vmatprep.mubr.f32.mxu1 %v1027_v61  ;;  %v1029_v30 = vand.u32 4294901760, %v1028_v41  ;;  %v1047_v10 = vand.u32 4294901760, %v3157_v40  ;;  %v1058_v28 = vsub.f32 %v3147_v25, %v1057_v6 }
 0x1e3   :  { %2321 = vmatprep.subr.mxu1 %v2963_v38 }
 0x1e4   :  { %2322 = vmatpush3.msra.mxu1 %v2963_v38  ;;  %2233 = vmatprep.mubr.f32.mxu0 %v1029_v30  ;;  %v1048_v14 = vsub.f32 %v3157_v40, %v1047_v10  ;;  %v1059_v36 = vand.u32 4294901760, %v1058_v28 }
 0x1e5   :  { %2323 = vmatprep.subr.mxu1 %v2966_v43  ;;  %2234 = vmatmul.mubr.f32.vlgmr.msra.gmra.mxu0 %v1039_v13 }
 0x1e6   :  { %2278 = vmatpush3.msra.mxu0 %v2939_v17  ;;  %2324 = vmatpush3.msra.mxu1 %v2966_v43  ;;  %v1049_v63 = vand.u32 4294901760, %v1048_v14  ;;  %v3410_v17 = vld [vmem:[#allocation21_spill] sm:$0xff] }
 0x1e7   :  { %2279 = vmatprep.subr.mxu0 %v2949_v22  ;;  %2325 = vmatprep.subr.mxu1 %v2968_v44 }
 0x1e8   :  { %2280 = vmatpush3.msra.mxu0 %v2949_v22  ;;  %2326 = vmatpush3.msra.mxu1 %v2968_v44  ;;  %v3411_v22 = vld [vmem:[#allocation23_spill] sm:$0xff] }
 0x1e9   :  { %2236 = vmatprep.mubr.f32.mxu0 %v1049_v63  ;;  %2281 = vmatprep.subr.mxu0 %v2961_v35 }
 0x1ea   :  { %2327 = vmatprep.subr.mxu1 %v2970_v45  ;;  %2237 = vmatmul.mubr.f32.gmra.mxu0 %v1059_v36 }
 0x1eb   :  { %2282 = vmatpush3.msra.mxu0 %v2961_v35  ;;  %2328 = vmatpush3.msra.mxu1 %v2970_v45  ;;  %v3415_v35 = vld [vmem:[#allocation10_spill] sm:$0xff] }
 0x1ec   :  { %2283 = vmatprep.subr.mxu0 %v2979_v53  ;;  %2309 = vmatprep.mubr.f32.mxu0 %v1026_v29 }
 0x1ed   :  { %2329 = vmatprep.subr.mxu1 %v3018_v32  ;;  %2284 = vmatpush3.msra.mxu0 %v2979_v53  ;;  %v3420_v53 = vld [vmem:[#allocation15_spill] sm:$0xff] }
 0x1ee   :  { %2330 = vmatpush3.msra.mxu1 %v3018_v32  ;;  %2285 = vmatprep.subr.mxu0 %v2983_v54 }
 0x1ef   :  { %2331 = vmatprep.subr.mxu1 %v3025_v3  ;;  %2286 = vmatpush3.msra.mxu0 %v2983_v54  ;;  %v3421_v54 = vld [vmem:[#allocation16_spill] sm:$0xff] }
 0x1f0   :  { %2332 = vmatpush3.msra.mxu1 %v3025_v3  ;;  %2287 = vmatprep.subr.mxu0 %v2986_v57 }
 0x1f1   :  { %2333 = vmatprep.subr.mxu1 %v3035_v33  ;;  %2288 = vmatpush3.msra.mxu0 %v2986_v57  ;;  %v3422_v57 = vld [vmem:[#allocation17_spill] sm:$0xff] }
 0x1f2   :  { %2334 = vmatpush3.msra.mxu1 %v3035_v33  ;;  %2289 = vmatprep.subr.mxu0 %v2989_v59 }
 0x1f3   :  { %2335 = vmatprep.subr.mxu1 %v3047_v55  ;;  %2290 = vmatpush3.msra.mxu0 %v2989_v59  ;;  %v3423_v59 = vld [vmem:[#allocation18_spill] sm:$0xff] }
 0x1f4   :  { %2336 = vmatpush3.msra.mxu1 %v3047_v55  ;;  %2291 = vmatprep.subr.mxu0 %v3023_v0 }
 0x1f5   :  { %2337 = vmatprep.subr.mxu1 %v3060_v9  ;;  %2292 = vmatpush3.msra.mxu0 %v3023_v0  ;;  %v3425_v0 = vld [vmem:[#allocation20_spill] sm:$0xff] }
 0x1f6   :  { %2338 = vmatpush3.msra.mxu1 %v3060_v9  ;;  %2293 = vmatprep.subr.mxu0 %v3033_v12 }
 0x1f7   :  { %2339 = vmatprep.subr.mxu1 %v3068_v20  ;;  %2294 = vmatpush3.msra.mxu0 %v3033_v12  ;;  %v3427_v12 = vld [vmem:[#allocation24_spill] sm:$0xff] }
 0x1f8   :  { %2340 = vmatpush3.msra.mxu1 %v3068_v20  ;;  %2295 = vmatprep.subr.mxu0 %v3045_v52 }
 0x1f9   :  { %2341 = vmatprep.subr.mxu1 %v3079_v47  ;;  %2296 = vmatpush3.msra.mxu0 %v3045_v52 }
 0x1fa   :  { %2342 = vmatpush3.msra.mxu1 %v3079_v47  ;;  %2297 = vmatprep.subr.mxu0 %v3057_v8 }
 0x1fb   :  { %2343 = vmatprep.subr.mxu1 %v3092_v31  ;;  %2298 = vmatpush3.msra.mxu0 %v3057_v8 }
 0x1fc   :  { %2344 = vmatpush3.msra.mxu1 %v3092_v31  ;;  %2299 = vmatprep.subr.mxu0 %v3071_v24 }
 0x1fd   :  { %2345 = vmatprep.subr.mxu1 %v3106_v56  ;;  %2300 = vmatpush3.msra.mxu0 %v3071_v24 }
 0x1fe   :  { %2346 = vmatpush3.msra.mxu1 %v3106_v56  ;;  %2301 = vmatprep.subr.mxu0 %v3077_v39 }
 0x1ff   :  { %2348 = vmatmul.mubr.f32.vlgmr.msra.gmra.mxu1 %v1037_v5  ;;  %2391 = vmatprep.subr.mxu1 %v2936_v15 }
 0x200   :  { %2302 = vmatpush3.msra.mxu0 %v3077_v39  ;;  %2350 = vmatprep.mubr.f32.mxu1 %v1047_v10 }
 0x201   :  { %2392 = vmatpush3.msra.mxu1 %v2936_v15  ;;  %2303 = vmatprep.subr.mxu0 %v3410_v17  ;;  %v3412_v15 = vld [vmem:[#allocation25_spill] sm:$0xff] }
 0x202   :  { %2393 = vmatprep.subr.mxu1 %v2941_v19  ;;  %2304 = vmatpush3.msra.mxu0 %v3410_v17 }
 0x203   :  { %2394 = vmatpush3.msra.mxu1 %v2941_v19  ;;  %2305 = vmatprep.subr.mxu0 %v3411_v22  ;;  %v3413_v19 = vld [vmem:[#allocation8_spill] sm:$0xff] }
 0x204   :  { %2351 = vmatmul.mubr.f32.gmra.mxu1 %v1057_v6  ;;  %2395 = vmatprep.subr.mxu1 %v2951_v23 }
 0x205   :  { %2306 = vmatpush3.msra.mxu0 %v3411_v22  ;;  %2396 = vmatpush3.msra.mxu1 %v2951_v23  ;;  %v3414_v23 = vld [vmem:[#allocation9_spill] sm:$0xff] }
 0x206   :  { %2423 = vmatprep.mubr.f32.mxu1 %v3138_v51  ;;  %2307 = vmatprep.subr.mxu0 %v3412_v15 }
 0x207   :  { %2397 = vmatprep.subr.mxu1 %v2963_v38  ;;  %2308 = vmatpush3.msra.mxu0 %v3412_v15 }
 0x208   :  { %2398 = vmatpush3.msra.mxu1 %v2963_v38  ;;  %2310 = vmatmul.mubr.f32.vlgmr.msra.gmra.mxu0 %v3136_v21  ;;  %v3416_v38 = vld [vmem:[#allocation11_spill] sm:$0xff] }
 0x209   :  { %2353 = vmatprep.subr.mxu0 %v3413_v19  ;;  %2399 = vmatprep.subr.mxu1 %v2966_v43 }
 0x20a   :  { %2312 = vmatprep.mubr.f32.mxu0 %v3157_v40  ;;  %2354 = vmatpush3.msra.mxu0 %v3413_v19 }
 0x20b   :  { %2400 = vmatpush3.msra.mxu1 %v2966_v43  ;;  %2355 = vmatprep.subr.mxu0 %v3414_v23  ;;  %v3417_v43 = vld [vmem:[#allocation12_spill] sm:$0xff] }
 0x20c   :  { %2401 = vmatprep.subr.mxu1 %v2968_v44  ;;  %2356 = vmatpush3.msra.mxu0 %v3414_v23 }
 0x20d   :  { %2402 = vmatpush3.msra.mxu1 %v2968_v44  ;;  %2313 = vmatmul.mubr.f32.gmra.mxu0 %v3147_v25  ;;  %v3418_v44 = vld [vmem:[#allocation13_spill] sm:$0xff] }
 0x20e   :  { %2357 = vmatprep.subr.mxu0 %v3415_v35  ;;  %2403 = vmatprep.subr.mxu1 %v2970_v45 }
 0x20f   :  { %2358 = vmatpush3.msra.mxu0 %v3415_v35  ;;  %2385 = vmatprep.mubr.f32.mxu0 %v3138_v51 }
 0x210   :  { %2404 = vmatpush3.msra.mxu1 %v2970_v45  ;;  %2359 = vmatprep.subr.mxu0 %v3416_v38  ;;  %v3419_v45 = vld [vmem:[#allocation14_spill] sm:$0xff] }
 0x211   :  { %2405 = vmatprep.subr.mxu1 %v3018_v32  ;;  %2360 = vmatpush3.msra.mxu0 %v3416_v38 }
 0x212   :  { %2406 = vmatpush3.msra.mxu1 %v3018_v32  ;;  %2361 = vmatprep.subr.mxu0 %v3417_v43  ;;  %v3424_v32 = vld [vmem:[#allocation19_spill] sm:$0xff] }
 0x213   :  { %2407 = vmatprep.subr.mxu1 %v3025_v3  ;;  %2362 = vmatpush3.msra.mxu0 %v3417_v43 }
 0x214   :  { %2408 = vmatpush3.msra.mxu1 %v3025_v3  ;;  %2363 = vmatprep.subr.mxu0 %v3418_v44  ;;  %v3426_v3 = vld [vmem:[#allocation22_spill] sm:$0xff] }
 0x215   :  { %2409 = vmatprep.subr.mxu1 %v3035_v33  ;;  %2364 = vmatpush3.msra.mxu0 %v3418_v44 }
 0x216   :  { %2410 = vmatpush3.msra.mxu1 %v3035_v33  ;;  %2365 = vmatprep.subr.mxu0 %v3419_v45  ;;  %v3428_v33 = vld [vmem:[#allocation26_spill] sm:$0xff] }
 0x217   :  { %2411 = vmatprep.subr.mxu1 %v3047_v55  ;;  %2366 = vmatpush3.msra.mxu0 %v3419_v45 }
 0x218   :  { %2412 = vmatpush3.msra.mxu1 %v3047_v55  ;;  %2367 = vmatprep.subr.mxu0 %v3420_v53 }
 0x219   :  { %2413 = vmatprep.subr.mxu1 %v3060_v9  ;;  %2368 = vmatpush3.msra.mxu0 %v3420_v53 }
 0x21a   :  { %2414 = vmatpush3.msra.mxu1 %v3060_v9  ;;  %2369 = vmatprep.subr.mxu0 %v3421_v54 }
 0x21b   :  { %2415 = vmatprep.subr.mxu1 %v3068_v20  ;;  %2370 = vmatpush3.msra.mxu0 %v3421_v54 }
 0x21c   :  { %2416 = vmatpush3.msra.mxu1 %v3068_v20  ;;  %2371 = vmatprep.subr.mxu0 %v3422_v57 }
 0x21d   :  { %2417 = vmatprep.subr.mxu1 %v3079_v47  ;;  %2372 = vmatpush3.msra.mxu0 %v3422_v57 }
 0x21e   :  { %2418 = vmatpush3.msra.mxu1 %v3079_v47  ;;  %2373 = vmatprep.subr.mxu0 %v3423_v59 }
 0x21f   :  { %2419 = vmatprep.subr.mxu1 %v3092_v31  ;;  %2374 = vmatpush3.msra.mxu0 %v3423_v59 }
 0x220   :  { %2420 = vmatpush3.msra.mxu1 %v3092_v31  ;;  %2375 = vmatprep.subr.mxu0 %v3424_v32 }
 0x221   :  { %2421 = vmatprep.subr.mxu1 %v3106_v56  ;;  %2376 = vmatpush3.msra.mxu0 %v3424_v32 }
 0x222   :  { %2422 = vmatpush3.msra.mxu1 %v3106_v56  ;;  %2377 = vmatprep.subr.mxu0 %v3425_v0  ;;  %v1732_v56 = vld [vmem:[%s3335_s6] ss:$0 sm:$0xff] }
 0x223   :  { %2424 = vmatmul.mubr.f32.vlgmr.msra.gmra.mxu1 %v3133_v60  ;;  %2378 = vmatpush3.msra.mxu0 %v3425_v0 }
 0x224   :  { %2426 = vmatprep.mubr.f32.mxu1 %v3149_v49  ;;  %2379 = vmatprep.subr.mxu0 %v3426_v3 }
 0x225   :  { %2380 = vmatpush3.msra.mxu0 %v3426_v3 }
 0x226   :  { %2381 = vmatprep.subr.mxu0 %v3427_v12 }
 0x227   :  { %2427 = vmatmul.mubr.f32.gmra.mxu1 %v3142_v7  ;;  %2382 = vmatpush3.msra.mxu0 %v3427_v12 }
 0x228   :  { %2383 = vmatprep.subr.mxu0 %v3428_v33 }
 0x229   :  { %2384 = vmatpush3.msra.mxu0 %v3428_v33 }
 0x22a   :  { %2386 = vmatmul.mubr.f32.vlgmr.msra.gmra.mxu0 %v3133_v60 }
 0x22b   :  { %2388 = vmatprep.mubr.f32.mxu0 %v3149_v49 }
 0x22e   :  { %2389 = vmatmul.mubr.f32.gmra.mxu0 %v3142_v7 }
 0x29d   :  { %v2273_v52 = vpop.f32.mrf.mxu1 }
 0x29f   :  { %v1212_v55 = vpop.f32.mrf.mxu1 }
 0x2a1   :  { %v2276_v9 = vpop.f32.mrf.mxu1 }
 0x2a3   :  { %v1224_v24 = vpop.f32.mrf.mxu1 }
 0x2a5   :  { %v2235_v8 = vpop.f32.mrf.mxu0 }
 0x2a6   :  { %v1042_v34 = vadd.f32 %v2235_v8, %v1732_v56 }
 0x2a7   :  { %v1031_v20 = vpop.f32.mrf.mxu0 }
 0x2a8   :  { %v1032_v4 = vadd.f32 %v1732_v56, %v1031_v20  ;;  %v1219_v62 = vadd.f32 %v2273_v52, %v1042_v34 }
 0x2aa   :  { %v2238_v39 = vpop.f32.mrf.mxu0  ;;  %v1213_v18 = vadd.f32 %v1212_v55, %v1032_v4 }
 0x2ab   :  { %v1062_v48 = vadd.f32 %v2238_v39, %v1732_v56 }
 0x2ac   :  { %v1051_v31 = vpop.f32.mrf.mxu0 }
 0x2ad   :  { %v1052_v16 = vadd.f32 %v1732_v56, %v1051_v31  ;;  %v1231_v2 = vadd.f32 %v2276_v9, %v1062_v48 }
 0x2af   :  { %v1225_v29 = vadd.f32 %v1224_v24, %v1052_v16 }
 0x2bf   :  { %v2349_v47 = vpop.f32.mrf.mxu1 }
 0x2c1   :  { %v1444_v26 = vpop.f32.mrf.mxu1 }
 0x2c4   :  { %v2352_v37 = vpop.f32.mrf.mxu1 }
 0x2c6   :  { %v1460_v60 = vpop.f32.mrf.mxu1 }
 0x2c8   :  { %v2311_v58 = vpop.f32.mrf.mxu0 }
 0x2c9   :  { %v1342_v50 = vadd.f32 %v2311_v58, %v1219_v62 }
 0x2ca   :  { %v1334_v27 = vpop.f32.mrf.mxu0 }
 0x2cb   :  { %v1335_v51 = vadd.f32 %v1334_v27, %v1213_v18  ;;  %v1453_v7 = vadd.f32 %v2349_v47, %v1342_v50 }
 0x2cd   :  { %v2314_v11 = vpop.f32.mrf.mxu0  ;;  %v1445_v42 = vadd.f32 %v1444_v26, %v1335_v51 }
 0x2ce   :  { %v1356_v5 = vadd.f32 %v2314_v11, %v1231_v2 }
 0x2cf   :  { %v1348_v1 = vpop.f32.mrf.mxu0 }
 0x2d0   :  { %v1349_v49 = vadd.f32 %v1348_v1, %v1225_v29  ;;  %v1469_v30 = vadd.f32 %v2352_v37, %v1356_v5 }
 0x2d2   :  { %v1461_v63 = vadd.f32 %v1460_v60, %v1349_v49 }
 0x2e3   :  { %v2425_v21 = vpop.f32.mrf.mxu1 }
 0x2e5   :  { %v1692_v46 = vpop.f32.mrf.mxu1 }
 0x2e7   :  { %v2428_v10 = vpop.f32.mrf.mxu1 }
 0x2e9   :  { %v1704_v15 = vpop.f32.mrf.mxu1 }
 0x2ea   :  { %v2387_v25 = vpop.f32.mrf.mxu0 }
 0x2eb   :  { %v1594_v61 = vadd.f32 %v2387_v25, %v1453_v7 }
 0x2ec   :  { %v1587_v40 = vpop.f32.mrf.mxu0 }
 0x2ed   :  { %v1699_v41 = vadd.f32 %v2425_v21, %v1594_v61  ;;  %v1588_v6 = vadd.f32 %v1587_v40, %v1445_v42 }
 0x2ee   :  { %v2390_v13 = vpop.f32.mrf.mxu0 }
 0x2ef   :  { %1716 = vst.msk [vmem:[%s3336_s7 + $0x8] sm:$0xff] %vm1714_vm0, %v1699_v41  ;;  %v1693_v14 = vadd.f32 %v1692_v46, %v1588_v6  ;;  %v1606_v28 = vadd.f32 %v2390_v13, %v1469_v30 }
 0x2f0   :  { %v1599_v36 = vpop.f32.mrf.mxu0 }
 0x2f1   :  { %1715 = vst.msk [vmem:[%s3336_s7] sm:$0xff] %vm1714_vm0, %v1693_v14  ;;  %v1711_v17 = vadd.f32 %v2428_v10, %v1606_v28  ;;  %v1600_v22 = vadd.f32 %v1599_v36, %v1461_v63 }
 0x2f3   :  { %1718 = vst.msk [vmem:[%s3336_s7 + $0x18] sm:$0xff] %vm1714_vm0, %v1711_v17  ;;  %v1705_v19 = vadd.f32 %v1704_v15, %v1600_v22 }
 0x2f5   :  { %1717 = vst.msk [vmem:[%s3336_s7 + $0x10] sm:$0xff] %vm1714_vm0, %v1705_v19 }
 0x2f6   :  { %1723 = vsyncpa [#allocation3], 1 }
 0x2f7   :  { %1724 = vsyncpa [#allocation5], 1 }

</bundles_post_ra>
